<compile_context>
chip_gen: v6e
topology: v6e:2x2x1
jax: 0.10.0
libtpu: 0.0.40
codegen_flags: <defaults>
</compile_context>

<pallas_src>
import functools
import math

import jax
import jax.numpy as jnp
import numpy as np
from jax import lax
from jax.experimental import pallas as pl
from jax.experimental.pallas import tpu as pltpu


# ------------------------------ Pallas kernel ------------------------------ #

def _qkv_attn_kernel(q_ref, k_ref, v_ref, o_ref,
                     qt_sc, m_sc, l_sc, acc_sc, *, scale):
    """Flash-attention step for one (batch, head, q-tile, kv-tile) grid point.

    q_ref, k_ref, v_ref : channel-major tiles (C, tq) / (C, tk)
    o_ref               : channel-major output tile (C, tq)
    qt_sc               : (tq, C)  pre-scaled, transposed q tile (input dtype)
    m_sc, l_sc          : (tq, 1)  running max / running sum (f32)
    acc_sc              : (tq, C)  unnormalized output accumulator (f32)
    """
    kv = pl.program_id(3)

    @pl.when(kv == 0)
    def _init():
        # Transpose the query tile once per q-tile; reused for every kv step.
        qt_sc[...] = jnp.transpose(q_ref[...] * scale).astype(qt_sc.dtype)
        m_sc[...] = jnp.full(m_sc.shape, -jnp.inf, dtype=m_sc.dtype)
        l_sc[...] = jnp.zeros(l_sc.shape, dtype=l_sc.dtype)
        acc_sc[...] = jnp.zeros(acc_sc.shape, dtype=acc_sc.dtype)

    k = k_ref[...] * scale                                          # (C, tk)
    # s[t, s] = sum_c q[c, t] * k[c, s]   (MXU, f32 accumulation)
    s = jnp.dot(qt_sc[...], k, preferred_element_type=jnp.float32)  # (tq, tk)

    m_prev = m_sc[...]                                              # (tq, 1)
    m_new = jnp.maximum(m_prev, jnp.max(s, axis=-1, keepdims=True))
    alpha = jnp.exp(m_prev - m_new)                                 # (tq, 1)
    p = jnp.exp(s - m_new)                                          # (tq, tk), f32

    l_sc[...] = alpha * l_sc[...] + jnp.sum(p, axis=-1, keepdims=True)
    # pv[t, c] = sum_s p[t, s] * v[c, s]   (transpose-rhs matmul on the MXU)
    pv = lax.dot_general(p.astype(v_ref.dtype), v_ref[...],
                         (((1,), (1,)), ((), ())),
                         preferred_element_type=jnp.float32)        # (tq, C)
    acc_sc[...] = acc_sc[...] * alpha + pv
    m_sc[...] = m_new

    @pl.when(kv == pl.num_programs(3) - 1)
    def _finalize():
        out = acc_sc[...] * pl.reciprocal(l_sc[...], approx=False)  # (tq, C)
        # Back to channel-major: lane-dense (C, tq) store, one transpose per q-tile.
        o_ref[...] = jnp.transpose(out).astype(o_ref.dtype)


# --------------------------------- Wrapper ---------------------------------- #

def _pick_seq_tile(t):
    for cand in (512, 256, 128):
        if t % cand == 0:
            return cand
    return t  # small / odd T: one full-sequence tile (full-dim block is always legal)


def qkv_attention(qkv, n_heads):
    """Pallas forward of QKVAttention: qkv [N, 3*H*C, T] -> [N, H*C, T]."""
    N, width, T = qkv.shape
    assert width % (3 * n_heads) == 0
    ch = width // (3 * n_heads)
    scale = 1.0 / math.sqrt(math.sqrt(ch))

    # Free contiguous reshape: channel axis decomposes as (qkv-slot, head, channel).
    qkv5 = qkv.reshape(N, 3, n_heads, ch, T)

    tq = tk = _pick_seq_tile(T)
    grid = (N, n_heads, T // tq, T // tk)

    def q_map(n, h, i, j): return (n, 0, h, 0, i)
    def k_map(n, h, i, j): return (n, 1, h, 0, j)
    def v_map(n, h, i, j): return (n, 2, h, 0, j)

    kernel = functools.partial(_qkv_attn_kernel, scale=scale)

    itemsize = qkv.dtype.itemsize
    cost = pl.CostEstimate(
        flops=4 * N * n_heads * ch * T * T,              # QK^T and PV matmuls
        transcendentals=N * n_heads * T * T,             # exp in softmax
        bytes_accessed=(qkv.size + N * n_heads * ch * T) * itemsize)

    out = pl.pallas_call(
        kernel,
        out_shape=jax.ShapeDtypeStruct((N, n_heads, ch, T), qkv.dtype),
        grid_spec=pltpu.PrefetchScalarGridSpec(
            num_scalar_prefetch=0,
            grid=grid,
            in_specs=[
                pl.BlockSpec((None, None, None, ch, tq), q_map),
                pl.BlockSpec((None, None, None, ch, tk), k_map),
                pl.BlockSpec((None, None, None, ch, tk), v_map),
            ],
            out_specs=pl.BlockSpec((None, None, ch, tq),
                                   lambda n, h, i, j: (n, h, 0, i)),
            scratch_shapes=[
                pltpu.VMEM((tq, ch), qkv.dtype),    # transposed, pre-scaled q tile
                pltpu.VMEM((tq, 1), jnp.float32),   # running max
                pltpu.VMEM((tq, 1), jnp.float32),   # running sum
                pltpu.VMEM((tq, ch), jnp.float32),  # output accumulator
            ],
        ),
        compiler_params=pltpu.CompilerParams(
            dimension_semantics=("parallel", "parallel", "parallel", "arbitrary")),
        cost_estimate=cost,
    )(qkv5, qkv5, qkv5)     # same HBM buffer, three views (q / k / v BlockSpecs)

    return out.reshape(N, n_heads * ch, T)


# ------------------------------ Pure-JAX reference --------------------------- #

def qkv_attention_ref(qkv, n_heads):
    N, width, T = qkv.shape
    ch = width // (3 * n_heads)
    scale = 1.0 / math.sqrt(math.sqrt(ch))
    q, k, v = jnp.split(qkv, 3, axis=1)
    q = (q * scale).reshape(N * n_heads, ch, T)
    k = (k * scale).reshape(N * n_heads, ch, T)
    v = v.reshape(N * n_heads, ch, T)
    w = jnp.einsum('bct,bcs->bts', q, k, precision=lax.Precision.HIGHEST)
    w = jax.nn.softmax(w.astype(jnp.float32), axis=-1).astype(qkv.dtype)
    a = jnp.einsum('bts,bcs->bct', w, v, precision=lax.Precision.HIGHEST)
    return a.reshape(N, n_heads * ch, T)


# ----------------------------------- Main ------------------------------------ #

if __name__ == "__main__":
    key = jax.random.PRNGKey(0)

    # Small, TPU-friendly shapes: N=2, heads=2, head-channels=64, tokens=128
    # -> qkv of shape (2, 3*2*64, 128) = (2, 384, 128).
    N, n_heads, ch, T = 2, 2, 64, 128
    qkv = jax.random.normal(key, (N, 3 * n_heads * ch, T), dtype=jnp.float32)

    out = jax.block_until_ready(qkv_attention(qkv, n_heads))
    assert out.shape == (N, n_heads * ch, T)

    ref = qkv_attention_ref(qkv, n_heads)
    np.testing.assert_allclose(np.asarray(out), np.asarray(ref),
                               rtol=5e-4, atol=5e-4)

    print("KERNEL_OK")
</pallas_src>

<mosaic_0001>
module attributes {stable_mosaic.version = 11 : i64} {
  func.func @_qkv_attn_kernel(%arg0: i32, %arg1: i32, %arg2: i32, %arg3: i32, %arg4: memref<1x1x1x64x128xf32, #tpu.memory_space<vmem>>, %arg5: memref<1x1x1x64x128xf32, #tpu.memory_space<vmem>>, %arg6: memref<1x1x1x64x128xf32, #tpu.memory_space<vmem>>, %arg7: memref<1x1x64x128xf32, #tpu.memory_space<vmem>>, %arg8: memref<128x64xf32, #tpu.memory_space<vmem>>, %arg9: memref<128x1xf32, #tpu.memory_space<vmem>>, %arg10: memref<128x1xf32, #tpu.memory_space<vmem>>, %arg11: memref<128x64xf32, #tpu.memory_space<vmem>>) attributes {dimension_semantics = [#tpu.dimension_semantics<parallel>, #tpu.dimension_semantics<parallel>, #tpu.dimension_semantics<parallel>, #tpu.dimension_semantics<arbitrary>], iteration_bounds = array<i64: 2, 2, 1, 1>, scalar_prefetch = 0 : i64, scratch_operands = 4 : i64, tpu.core_type = #tpu.core_type<tc>, window_params = [{transform_indices = @transform_0, window_bounds = array<i64: 1, 1, 1, 64, 128>}, {transform_indices = @transform_1, window_bounds = array<i64: 1, 1, 1, 64, 128>}, {transform_indices = @transform_2, window_bounds = array<i64: 1, 1, 1, 64, 128>}, {transform_indices = @transform_3, window_bounds = array<i64: 1, 1, 64, 128>}]} {
    %c0_i32 = arith.constant 0 : i32
    %0 = arith.cmpi eq, %arg3, %c0_i32 : i32
    %1 = arith.extui %0 : i1 to i32
    %c0_i32_0 = arith.constant 0 : i32
    %2 = arith.cmpi ne, %1, %c0_i32_0 : i32
    scf.if %2 {
      %c0_30 = arith.constant 0 : index
      %c0_31 = arith.constant 0 : index
      %c0_32 = arith.constant 0 : index
      %c0_33 = arith.constant 0 : index
      %c0_34 = arith.constant 0 : index
      %36 = vector.load %arg4[%c0_30, %c0_31, %c0_32, %c0_33, %c0_34] : memref<1x1x1x64x128xf32, #tpu.memory_space<vmem>>, vector<1x1x1x64x128xf32>
      %37 = vector.shape_cast %36 : vector<1x1x1x64x128xf32> to vector<64x128xf32>
      %cst_35 = arith.constant 0.353553385 : f32
      %38 = vector.broadcast %cst_35 : f32 to vector<64x128xf32>
      %39 = arith.mulf %37, %38 : vector<64x128xf32>
      %40 = tpu.transpose %39, [1, 0] : vector<64x128xf32> -> vector<128x64xf32>
      %c0_36 = arith.constant 0 : index
      %c0_37 = arith.constant 0 : index
      %41 = vector.load %arg8[%c0_36, %c0_37] : memref<128x64xf32, #tpu.memory_space<vmem>>, vector<128x64xf32>
      tpu.vector_store %arg8[%c0_36, %c0_37], %40 {strides = array<i32>} : memref<128x64xf32, #tpu.memory_space<vmem>>, vector<128x64xf32>,
      %cst_38 = arith.constant 0xFF800000 : f32
      %42 = vector.broadcast %cst_38 : f32 to vector<128x1xf32>
      %c0_39 = arith.constant 0 : index
      %c0_40 = arith.constant 0 : index
      %43 = vector.load %arg9[%c0_39, %c0_40] : memref<128x1xf32, #tpu.memory_space<vmem>>, vector<128x1xf32>
      tpu.vector_store %arg9[%c0_39, %c0_40], %42 {strides = array<i32>} : memref<128x1xf32, #tpu.memory_space<vmem>>, vector<128x1xf32>,
      %cst_41 = arith.constant 0.000000e+00 : f32
      %44 = vector.broadcast %cst_41 : f32 to vector<128x1xf32>
      %c0_42 = arith.constant 0 : index
      %c0_43 = arith.constant 0 : index
      %45 = vector.load %arg10[%c0_42, %c0_43] : memref<128x1xf32, #tpu.memory_space<vmem>>, vector<128x1xf32>
      tpu.vector_store %arg10[%c0_42, %c0_43], %44 {strides = array<i32>} : memref<128x1xf32, #tpu.memory_space<vmem>>, vector<128x1xf32>,
      %cst_44 = arith.constant 0.000000e+00 : f32
      %46 = vector.broadcast %cst_44 : f32 to vector<128x64xf32>
      %c0_45 = arith.constant 0 : index
      %c0_46 = arith.constant 0 : index
      %47 = vector.load %arg11[%c0_45, %c0_46] : memref<128x64xf32, #tpu.memory_space<vmem>>, vector<128x64xf32>
      tpu.vector_store %arg11[%c0_45, %c0_46], %46 {strides = array<i32>} : memref<128x64xf32, #tpu.memory_space<vmem>>, vector<128x64xf32>,
    } else {
    }
    %c0 = arith.constant 0 : index
    %c0_1 = arith.constant 0 : index
    %c0_2 = arith.constant 0 : index
    %c0_3 = arith.constant 0 : index
    %c0_4 = arith.constant 0 : index
    %3 = vector.load %arg5[%c0, %c0_1, %c0_2, %c0_3, %c0_4] : memref<1x1x1x64x128xf32, #tpu.memory_space<vmem>>, vector<1x1x1x64x128xf32>
    %4 = vector.shape_cast %3 : vector<1x1x1x64x128xf32> to vector<64x128xf32>
    %cst = arith.constant 0.353553385 : f32
    %5 = vector.broadcast %cst : f32 to vector<64x128xf32>
    %6 = arith.mulf %4, %5 : vector<64x128xf32>
    %c0_5 = arith.constant 0 : index
    %c0_6 = arith.constant 0 : index
    %7 = vector.load %arg8[%c0_5, %c0_6] : memref<128x64xf32, #tpu.memory_space<vmem>>, vector<128x64xf32>
    %cst_7 = arith.constant dense<0.000000e+00> : vector<128x128xf32>
    %8 = tpu.matmul %7, %6, %cst_7 {dimension_numbers = #tpu.dot_dimension_numbers<[1], [0], [0], [1], [0, 0, 1, 1], [], []>} : vector<128x64xf32>, vector<64x128xf32>, vector<128x128xf32> -> vector<128x128xf32>
    %c0_8 = arith.constant 0 : index
    %c0_9 = arith.constant 0 : index
    %9 = vector.load %arg9[%c0_8, %c0_9] : memref<128x1xf32, #tpu.memory_space<vmem>>, vector<128x1xf32>
    %cst_10 = arith.constant dense<0xFF800000> : vector<128xf32>
    %10 = vector.multi_reduction <maximumf>, %8, %cst_10 [1] : vector<128x128xf32> to vector<128xf32>
    %11 = vector.shape_cast %10 : vector<128xf32> to vector<128x1xf32>
    %12 = arith.maximumf %9, %11 : vector<128x1xf32>
    %13 = arith.subf %9, %12 : vector<128x1xf32>
    %14 = math.exp %13 : vector<128x1xf32>
    %15 = vector.broadcast %12 : vector<128x1xf32> to vector<128x128xf32>
    %16 = arith.subf %8, %15 : vector<128x128xf32>
    %17 = math.exp %16 : vector<128x128xf32>
    %c0_11 = arith.constant 0 : index
    %c0_12 = arith.constant 0 : index
    %18 = vector.load %arg10[%c0_11, %c0_12] : memref<128x1xf32, #tpu.memory_space<vmem>>, vector<128x1xf32>
    %19 = arith.mulf %14, %18 : vector<128x1xf32>
    %cst_13 = arith.constant dense<0.000000e+00> : vector<128xf32>
    %20 = vector.multi_reduction <add>, %17, %cst_13 [1] : vector<128x128xf32> to vector<128xf32>
    %21 = vector.shape_cast %20 : vector<128xf32> to vector<128x1xf32>
    %22 = arith.addf %19, %21 : vector<128x1xf32>
    %c0_14 = arith.constant 0 : index
    %c0_15 = arith.constant 0 : index
    %23 = vector.load %arg10[%c0_14, %c0_15] : memref<128x1xf32, #tpu.memory_space<vmem>>, vector<128x1xf32>
    tpu.vector_store %arg10[%c0_14, %c0_15], %22 {strides = array<i32>} : memref<128x1xf32, #tpu.memory_space<vmem>>, vector<128x1xf32>,
    %c0_16 = arith.constant 0 : index
    %c0_17 = arith.constant 0 : index
    %c0_18 = arith.constant 0 : index
    %c0_19 = arith.constant 0 : index
    %c0_20 = arith.constant 0 : index
    %24 = vector.load %arg6[%c0_16, %c0_17, %c0_18, %c0_19, %c0_20] : memref<1x1x1x64x128xf32, #tpu.memory_space<vmem>>, vector<1x1x1x64x128xf32>
    %25 = vector.shape_cast %24 : vector<1x1x1x64x128xf32> to vector<64x128xf32>
    %cst_21 = arith.constant dense<0.000000e+00> : vector<128x64xf32>
    %26 = tpu.matmul %17, %25, %cst_21 {dimension_numbers = #tpu.dot_dimension_numbers<[1], [1], [0], [0], [0, 0, 1, 0], [], []>} : vector<128x128xf32>, vector<64x128xf32>, vector<128x64xf32> -> vector<128x64xf32>
    %c0_22 = arith.constant 0 : index
    %c0_23 = arith.constant 0 : index
    %27 = vector.load %arg11[%c0_22, %c0_23] : memref<128x64xf32, #tpu.memory_space<vmem>>, vector<128x64xf32>
    %28 = vector.broadcast %14 : vector<128x1xf32> to vector<128x64xf32>
    %29 = arith.mulf %27, %28 : vector<128x64xf32>
    %30 = arith.addf %29, %26 : vector<128x64xf32>
    %c0_24 = arith.constant 0 : index
    %c0_25 = arith.constant 0 : index
    %31 = vector.load %arg11[%c0_24, %c0_25] : memref<128x64xf32, #tpu.memory_space<vmem>>, vector<128x64xf32>
    tpu.vector_store %arg11[%c0_24, %c0_25], %30 {strides = array<i32>} : memref<128x64xf32, #tpu.memory_space<vmem>>, vector<128x64xf32>,
    %c0_26 = arith.constant 0 : index
    %c0_27 = arith.constant 0 : index
    %32 = vector.load %arg9[%c0_26, %c0_27] : memref<128x1xf32, #tpu.memory_space<vmem>>, vector<128x1xf32>
    tpu.vector_store %arg9[%c0_26, %c0_27], %12 {strides = array<i32>} : memref<128x1xf32, #tpu.memory_space<vmem>>, vector<128x1xf32>,
    %c0_i32_28 = arith.constant 0 : i32
    %33 = arith.cmpi eq, %arg3, %c0_i32_28 : i32
    %34 = arith.extui %33 : i1 to i32
    %c0_i32_29 = arith.constant 0 : i32
    %35 = arith.cmpi ne, %34, %c0_i32_29 : i32
    scf.if %35 {
      %c0_30 = arith.constant 0 : index
      %c0_31 = arith.constant 0 : index
      %36 = vector.load %arg11[%c0_30, %c0_31] : memref<128x64xf32, #tpu.memory_space<vmem>>, vector<128x64xf32>
      %c0_32 = arith.constant 0 : index
      %c0_33 = arith.constant 0 : index
      %37 = vector.load %arg10[%c0_32, %c0_33] : memref<128x1xf32, #tpu.memory_space<vmem>>, vector<128x1xf32>
      %38 = tpu.reciprocal %37 : vector<128x1xf32> -> vector<128x1xf32>
      %39 = vector.broadcast %38 : vector<128x1xf32> to vector<128x64xf32>
      %40 = arith.mulf %36, %39 : vector<128x64xf32>
      %41 = tpu.transpose %40, [1, 0] : vector<128x64xf32> -> vector<64x128xf32>
      %c0_34 = arith.constant 0 : index
      %c0_35 = arith.constant 0 : index
      %c0_36 = arith.constant 0 : index
      %c0_37 = arith.constant 0 : index
      %42 = vector.load %arg7[%c0_34, %c0_35, %c0_36, %c0_37] : memref<1x1x64x128xf32, #tpu.memory_space<vmem>>, vector<1x1x64x128xf32>
      %43 = vector.shape_cast %42 : vector<1x1x64x128xf32> to vector<64x128xf32>
      %44 = vector.shape_cast %41 : vector<64x128xf32> to vector<1x1x64x128xf32>
      tpu.vector_store %arg7[%c0_34, %c0_35, %c0_36, %c0_37], %44 {strides = array<i32>} : memref<1x1x64x128xf32, #tpu.memory_space<vmem>>, vector<1x1x64x128xf32>,
    } else {
    }
    return
  }
  func.func @transform_0(%arg0: i32, %arg1: i32, %arg2: i32, %arg3: i32) -> (i32, i32, i32, i32, i32) {
    %c0_i32 = arith.constant 0 : i32
    %c0_i32_0 = arith.constant 0 : i32
    %c0_i32_1 = arith.constant 0 : i32
    return %arg0, %c0_i32, %arg1, %c0_i32_0, %arg2 : i32, i32, i32, i32, i32
  }
  func.func @transform_1(%arg0: i32, %arg1: i32, %arg2: i32, %arg3: i32) -> (i32, i32, i32, i32, i32) {
    %c1_i32 = arith.constant 1 : i32
    %c0_i32 = arith.constant 0 : i32
    %c0_i32_0 = arith.constant 0 : i32
    return %arg0, %c1_i32, %arg1, %c0_i32, %arg3 : i32, i32, i32, i32, i32
  }
  func.func @transform_2(%arg0: i32, %arg1: i32, %arg2: i32, %arg3: i32) -> (i32, i32, i32, i32, i32) {
    %c2_i32 = arith.constant 2 : i32
    %c0_i32 = arith.constant 0 : i32
    %c0_i32_0 = arith.constant 0 : i32
    return %arg0, %c2_i32, %arg1, %c0_i32, %arg3 : i32, i32, i32, i32, i32
  }
  func.func @transform_3(%arg0: i32, %arg1: i32, %arg2: i32, %arg3: i32) -> (i32, i32, i32, i32) {
    %c0_i32 = arith.constant 0 : i32
    %c0_i32_0 = arith.constant 0 : i32
    return %arg0, %arg1, %c0_i32, %arg2 : i32, i32, i32, i32
  }
}

</mosaic_0001>

<bundles_post_ra>
// kernel: tpu_custom_call.1
= control target key start
LH: loop header
LB: loop body
LE: loop exit
PB: predicated region body
PF: predicated region fallthrough
CT: control target
= control target key end

     0   :  { %s2957_s0 = inlined_call_operand.hbm [shape: f32[2,3,2,64,128], index: 0, kind: input, shape index: {}]   ;;  %s2958_s1 = inlined_call_operand.hbm [shape: f32[2,3,2,64,128], index: 1, kind: input, shape index: {}]   ;;  %s2959_s2 = inlined_call_operand.hbm [shape: f32[2,3,2,64,128], index: 2, kind: input, shape index: {}]   ;;  %s2960_s3 = inlined_call_operand.hbm [shape: f32[2,2,64,128], index: 3, kind: output, shape index: {}]  }
   0x1   :  { %2969 = sst [smem:[#allocation22_spill]] %s2958_s1 }
   0x2   :  { %8 = vsyncpa [#allocation7], 0 }
   0x3   :  { %10 = vsyncpa [#allocation7 + $0x1], 0 }
   0x4   :  { %11 = vsyncpa [#allocation10], 0 }
   0x5   :  { %13 = vsyncpa [#allocation10 + $0x1], 0 }
   0x6   :  { %14 = vsyncpa [#allocation8], 0 }
   0x7   :  { %16 = vsyncpa [#allocation8 + $0x1], 0  ;;  %s2265_s12 = smov 0   ;;  %s2267_s13 = smov 0  }
   0x8   :  { %s2269_s14 = smov 0   ;;  %s2271_s15 = smov 0  }
   0x9   :  { %s2273_s16 = smov 0   ;;  %s2275_s17 = smov 0  }
   0xa   :  { %s2277_s18 = smov 0   ;;  %s2279_s19 = smov 0  }
   0xb LB: > { %2970 = sst [smem:[#allocation16_spill]] %s2224_s17  ;;  %s2306_s20 = sadd.s32 4294967295, %s2232_s19   ;;  %s2232_s19 = sphi %s2279_s19, %s22_s19   ;;  %s2228_s18 = sphi %s2277_s18, %s3003_s18   ;;  %s2224_s17 = sphi %s2275_s17, %s3002_s17   ;;  %s2220_s16 = sphi %s2273_s16, %s3001_s16   ;;  %s2216_s15 = sphi %s2271_s15, %s3000_s15   ;;  %s2212_s14 = sphi %s2269_s14, %s3006_s14   ;;  %s2208_s13 = sphi %s2267_s13, %s3005_s13   ;;  %s2204_s12 = sphi %s2265_s12, %s3004_s12  }
   0xc   : > { %2971 = sst [smem:[#allocation17_spill]] %s2228_s18  ;;  %s1669_s21 = sadd.s32 4294967294, %s2232_s19  }
   0xd   : > { %s44_s22 = sadd.s32 1, %s2224_s17  ;;  %s48_s23 = sadd.s32 1, %s2228_s18 }
   0xe   : > { %p46_p0 = scmp.ge.s32.totalorder %s44_s22, 2  ;;  %s59_s24 = sadd.s32 1, %s2212_s14 }
   0xf   : > { %p66_p1 = scmp.ne.s32.totalorder %s2212_s14, %s2208_s13  ;;  %p67_p2 = scmp.eq.s32.totalorder %s2232_s19, 0 }
  0x10   : > { %s3008_s22 = smov (%p46_p0, %s44_s22), 0  ;;  %s3010_s23 = smov (!%p46_p0, %s48_s23), %s2228_s18 }
  0x11   : > { %2972 = sst [smem:[#allocation18_spill]] %s3008_s22  ;;  %s53_s25 = ssub.s32 %s2224_s17, %s3008_s22 }
  0x12   : > { %p2320_p3 = por %p67_p2, %p66_p1  ;;  %p50_p4 = scmp.ge.s32.totalorder %s3010_s23, 2 }
  0x13   : > { %p72_p5 = scmp.ne.s32.totalorder %s2208_s13, %s2204_s12  ;;  %p73_p6 = scmp.eq.s32.totalorder %s2306_s20, 0 }
  0x14   : > { %p160_p7 = scmp.eq.s32.totalorder %s2306_s20, 3  ;;  %s3012_s23 = smov (%p50_p4, %s3010_s23), 0 }
  0x15   : > { %2974 = sst [smem:[#allocation19_spill]] %s3012_s23  ;;  %p2330_p8 = por %p73_p6, %p72_p5 }
  0x16   : > { %p2334_p9 = por %p160_p7, %p66_p1  ;;  %s52_s29 = ssub.s32 %s2228_s18, %s3012_s23 }
  0x17   : > { %p166_p10 = scmp.eq.s32.totalorder %s1669_s21, 3  ;;  %s54_s30 = sor.u32 %s53_s25, %s52_s29 }
  0x18   : > { %p57_p11 = scmp.eq.s32.totalorder %s54_s30, 0  ;;  %p1875_p13 = scmp.lt.s32.totalorder %s2232_s19, 4 }
  0x19   : > { %p2340_p12 = por %p166_p10, %p72_p5  ;;  %s2961_s5 = sand.u32 1, %s2212_s14  }
  0x1a   : > { %s2347_s6 = scalar_select %p57_p11, %s2212_s14, %s59_s24  }
  0x1b   : > { %s2977_s4 = scalar_select %p2340_p12, 1, 0 }
  0x1c   : > { %2979 = sst [smem:[#allocation21_spill]] %s2347_s6  ;;  %s2351_s7 = sshll.u32 %s2961_s5, 6 }
  0x1d   : > { %2978 = sst [smem:[#allocation20_spill]] %s2977_s4  ;;  %s1673_s8 = sshll.u32 %s2224_s17, 3 }
  0x1e   : > { %s1852_s9 = smul.u32 48, %s2228_s18  ;;  %p2357_p0 = pnand %p1875_p13, %p2320_p3 }
  0x1f   : > { %s210_s25 = sand.u32 1, %s2232_s19   ;;  %s2981_s1 = sld [smem:[#allocation22_spill]] }
  0x20   : > { %s197_s11 = sadd.s32 %s1852_s9, %s1673_s8  ;;  %s214_s5 = scalar_lea.vmem [#allocation9], %s2351_s7 }
  0x21   : > { %s2361_s21 = sshll.u32 %s197_s11, 7  ;;  %s225_s23 = sshll.u32 %s214_s5, 4  ;;  %s226_s23 = int_to_ptr.vmem [resolvable:$true] %s225_s23 }
  0x22   : > { %s2369_s26 = scalar_lea.sflag [#allocation10], %s210_s25  ;;  %p2048_p1 = pneg %p2357_p0 }
  0x23   : > { %s2059_s18 = scalar_lea.vmem %s226_s23, 1024  ;;  %s2234_s8 = smov [#allocation9]  }
  0x24   : > { %p2060_p2 = scmp.ne.s32.totalorder %s226_s23, %s2059_s18  ;;  %s2064_s9 = sshll.u32 %s2234_s8, 4  ;;  %s2065_s9 = int_to_ptr.vmem [resolvable:$false] %s2064_s9 }
  0x25   : > { %s1564_s30 = scalar_lea.hbm %s2981_s1, %s2361_s21  ;;  %s2066_s11 = scalar_lea.vmem %s2065_s9, 2048 }
  0x26   : > { %s1565_s22 = scalar_lea.hbm %s1564_s30, 2048  ;;  %p2062_p3 = pnand %p2060_p2, %p2048_p1 }
  0x27   : > { %p2067_p5 = scmp.lt.s32.totalorder %s226_s23, %s2065_s9  ;;  %p2068_p6 = scmp.lt.s32.totalorder %s2066_s11, %s2059_s18 }
  0x28   : > { %p2063_p4 = pneg %p2062_p3 }
  0x29   : > { %p2069_p7 = por %p2068_p6, %p2067_p5 }
  0x2b   : > { %p2070_p10 = pnand %p2069_p7, %p2063_p4 }
  0x2d   : > { %2073 = shalt.err (!%p2070_p10)
}
  0x2e   : > { %s2967_s5 = smov 128   ;;  %s2236_s25 = smov 8  }
  0x2f   : > { %1867 = dma.hbm_to_vmem [thread:$0]  (!%p2357_p0), %s1565_s22, 1024, %s226_s23, %s2369_s26, %s2967_s5, %s2967_s5, %s2236_s25  }
  0x30   : > { %p1681_p11 = scmp.ge.s32.totalorder %s2232_s19, 1  ;;  %p258_p13 = scmp.lt.s32.totalorder %s2232_s19, 5 }
  0x31   : > { %s199_s30 = scalar_lea.hbm %s2957_s0, %s2361_s21  ;;  %s190_s8 = scalar_lea.vmem [#allocation6], %s2351_s7 }
  0x32   : > { %p2384_p2 = pnand %p1681_p11, %p258_p13  ;;  %s200_s9 = sshll.u32 %s190_s8, 4  ;;  %s201_s9 = int_to_ptr.vmem [resolvable:$true] %s200_s9 }
  0x33   : > { %s1574_s17 = scalar_lea.hbm %s2959_s2, %s2361_s21  ;;  %s2983_s6 = sand.u32 1, %s2212_s14  }
  0x34   : > { %s187_s4 = scalar_lea.sflag [#allocation7], %s2983_s6  ;;  %s2088_s22 = scalar_lea.vmem %s201_s9, 1024 }
  0x35   : > { %p2089_p3 = scmp.ne.s32.totalorder %s201_s9, %s2088_s22  ;;  %s2237_s23 = smov [#allocation6]  }
  0x36   : > { %s2093_s5 = sshll.u32 %s2237_s23, 4  ;;  %s2094_s5 = int_to_ptr.vmem [resolvable:$false] %s2093_s5 }
  0x37   : > { %p2091_p4 = pnand %p2089_p3, %p2048_p1  ;;  %s2095_s24 = scalar_lea.vmem %s2094_s5, 2048 }
  0x38   : > { %p2096_p6 = scmp.lt.s32.totalorder %s201_s9, %s2094_s5  ;;  %p2097_p7 = scmp.lt.s32.totalorder %s2095_s24, %s2088_s22 }
  0x39   : > { %p2092_p5 = pneg %p2091_p4 }
  0x3a   : > { %p2098_p10 = por %p2097_p7, %p2096_p6 }
  0x3c   : > { %p2099_p11 = pnand %p2098_p10, %p2092_p5 }
  0x3e   : > { %2102 = shalt.err (!%p2099_p11)
}
  0x3f   : > { %s2984_s1 = smov 128   ;;  %s1575_s6 = scalar_lea.hbm %s1574_s17, 4096 }
  0x40   : > { %1864 = dma.hbm_to_vmem [thread:$0]  (!%p2357_p0), %s199_s30, 1024, %s201_s9, %s187_s4, %s2984_s1, %s2984_s1, %s2236_s25  }
  0x41   : > { %s239_s21 = scalar_lea.vmem [#allocation11], %s2351_s7  ;;  %s2238_s5 = smov [#allocation11]  }
  0x42   : > { %s250_s29 = sshll.u32 %s239_s21, 4  ;;  %s2121_s11 = sshll.u32 %s2238_s5, 4  ;;  %s251_s29 = int_to_ptr.vmem [resolvable:$true] %s250_s29  ;;  %s2122_s11 = int_to_ptr.vmem [resolvable:$false] %s2121_s11 }
  0x43   : > { %s2116_s8 = scalar_lea.vmem %s251_s29, 1024  ;;  %s2123_s22 = scalar_lea.vmem %s2122_s11, 2048 }
  0x44   : > { %p2117_p13 = scmp.ne.s32.totalorder %s251_s29, %s2116_s8  ;;  %p2124_p5 = scmp.lt.s32.totalorder %s251_s29, %s2122_s11 }
  0x45   : > { %p2125_p6 = scmp.lt.s32.totalorder %s2123_s22, %s2116_s8 }
  0x46   : > { %p2119_p3 = pnand %p2117_p13, %p2048_p1 }
  0x47   : > { %p2126_p7 = por %p2125_p6, %p2124_p5 }
  0x48   : > { %p2120_p4 = pneg %p2119_p3 }
  0x4a   : > { %p2127_p10 = pnand %p2126_p7, %p2120_p4 }
  0x4c   : > { %2130 = shalt.err (!%p2127_p10)
}
  0x4d   : > { %1870 = dma.hbm_to_vmem [thread:$0]  (!%p2357_p0), %s1575_s6, 1024, %s251_s29, %s2369_s26, %s2984_s1, %s2984_s1, %s2236_s25  }
  0x4e   : > { %262 = sbr.rel (%p2384_p2) target bundleno = 1161 (0x489), region = 32  ;;  %s2420_s17 = sand.u32 (!%p2384_p2), 1, %s2208_s13  }
  0x4f   : > { %s2423_s4 = sshll.u32 (!%p2384_p2), %s2420_s17, 6  ;;  %s265_s7 = scalar_lea.sflag (!%p2384_p2), [#allocation7], %s2420_s17 }
  0x50   : > { %s2427_s30 = scalar_lea.vmem (!%p2384_p2), [#allocation6], %s2423_s4 }
  0x53   : > { %2191 = dma.done.wait (%p2330_p8), %s265_s7, 1024  }
  0x54   : > { %2193 = vsyncadd (%p2330_p8), %s265_s7, 4294966272  ;;  %s273_s10 = sand.u32 1, %s2306_s20   ;;  %s2435_s25 = scalar_lea.vmem [#allocation9], %s2423_s4 }
  0x55   : > { %s274_s26 = scalar_lea.sflag [#allocation10], %s273_s10 }
  0x56   : > { %2195 = dma.done.wait (%p2330_p8), %s274_s26, 2048  }
  0x57   : > { %2197 = vsyncadd (%p2330_p8), %s274_s26, 4294965248  ;;  %v323_v0 = vld [vmem:[%s2427_s30] sm:$0xff]  ;;  %v324_v1 = vld [vmem:[%s2427_s30 + $0x8] sm:$0xff]  ;;  %vm371_vm0 = vcmask 523264   ;;  %vm388_vm1 = vcmask 7168   ;;  %s2586_s20 = scalar_lea.vmem [#allocation11], %s2423_s4 }
  0x58   : > { %v331_v2 = vmul.f32 0.35355338, %v323_v0  ;;  %v332_v3 = vmul.f32 0.35355338, %v324_v1  ;;  %v325_v4 = vld [vmem:[%s2427_s30 + $0x10] sm:$0xff]  ;;  %v444_v5 = vld [vmem:[%s2435_s25 + $0x38] sm:$0xff] }
  0x59   : > { %v452_v6 = vmul.f32 0.35355338, %v444_v5  ;;  %v443_v7 = vld [vmem:[%s2435_s25 + $0x30] sm:$0xff]  ;;  %v442_v8 = vld [vmem:[%s2435_s25 + $0x28] sm:$0xff]  ;;  %v441_v9 = vld [vmem:[%s2435_s25 + $0x20] sm:$0xff]  ;;  %v2239_v0 = vmov -inf  }
  0x5a   : > { %339 = vxpose.xlu0.b32.start [1/8] (short) %v331_v2, 128  ;;  %v333_v10 = vmul.f32 0.35355338, %v325_v4  ;;  %v451_v11 = vmul.f32 0.35355338, %v443_v7  ;;  %v450_v12 = vmul.f32 0.35355338, %v442_v8 }
  0x5b   : > { %1756 = vmatprep.subr.mxu0 %v452_v6  ;;  %v326_v13 = vld [vmem:[%s2427_s30 + $0x18] sm:$0xff]  ;;  %v449_v15 = vmul.f32 0.35355338, %v441_v9  ;;  %v439_v16 = vld [vmem:[%s2435_s25 + $0x10] sm:$0xff]  ;;  %v327_v19 = vld [vmem:[%s2427_s30 + $0x20] sm:$0xff]  ;;  %390 = vst.msk [vmem:[#allocation3 + $0x8] sm:$0xff] %vm388_vm1, %v2239_v0 }
  0x5c   : > { %1757 = vmatpush3.msra.mxu0 %v452_v6  ;;  %v440_v14 = vld [vmem:[%s2435_s25 + $0x18] sm:$0xff]  ;;  %v334_v17 = vmul.f32 0.35355338, %v326_v13  ;;  %v438_v20 = vld [vmem:[%s2435_s25 + $0x8] sm:$0xff]  ;;  %v447_v21 = vmul.f32 0.35355338, %v439_v16 }
  0x5d   : > { %1758 = vmatprep.subr.mxu0 %v451_v11  ;;  %v448_v18 = vmul.f32 0.35355338, %v440_v14  ;;  %v437_v22 = vld [vmem:[%s2435_s25] sm:$0xff]  ;;  %v335_v23 = vmul.f32 0.35355338, %v327_v19  ;;  %v328_v25 = vld [vmem:[%s2427_s30 + $0x28] sm:$0xff] }
  0x5e   : > { %340 = vxpose.xlu0.b32.cont [2/8] (short) %v332_v3, 128  ;;  %1759 = vmatpush3.msra.mxu0 %v451_v11  ;;  %v446_v24 = vmul.f32 0.35355338, %v438_v20  ;;  %v445_v26 = vmul.f32 0.35355338, %v437_v22  ;;  %v336_v27 = vmul.f32 0.35355338, %v328_v25 }
  0x5f   : > { %1760 = vmatprep.subr.mxu0 %v450_v12  ;;  %v329_v28 = vld [vmem:[%s2427_s30 + $0x30] sm:$0xff]  ;;  %v330_v30 = vld [vmem:[%s2427_s30 + $0x38] sm:$0xff]  ;;  %389 = vst.msk [vmem:[#allocation3] sm:$0xff] %vm388_vm1, %v2239_v0  ;;  %391 = vst.msk [vmem:[#allocation3 + $0x10] sm:$0xff] %vm388_vm1, %v2239_v0  ;;  %v2240_v5 = vmov 0   ;;  %v2241_v8 = vmov 0.0  }
  0x60   : > { %1761 = vmatpush3.msra.mxu0 %v450_v12  ;;  %v337_v29 = vmul.f32 0.35355338, %v329_v28  ;;  %v338_v31 = vmul.f32 0.35355338, %v330_v30  ;;  %392 = vst.msk [vmem:[#allocation3 + $0x18] sm:$0xff] %vm388_vm1, %v2239_v0  ;;  %393 = vst.msk [vmem:[#allocation3 + $0x20] sm:$0xff] %vm388_vm1, %v2239_v0  ;;  %1948 = vset.pattern.permute.xlu1 %v2240_v5 }
  0x61   : > { %1762 = vmatprep.subr.mxu0 %v449_v15  ;;  %394 = vst.msk [vmem:[#allocation3 + $0x28] sm:$0xff] %vm388_vm1, %v2239_v0  ;;  %395 = vst.msk [vmem:[#allocation3 + $0x30] sm:$0xff] %vm388_vm1, %v2239_v0  ;;  %v1007_v19 = vld [vmem:[%s2586_s20 + $0x38] sm:$0xff]  ;;  %v1006_v20 = vld [vmem:[%s2586_s20 + $0x30] sm:$0xff]  ;;  %s318_s27 = scalar_lea.vmem [#allocation12], %s2423_s4  ;;  %s1703_s18 = sshll.u32 %s2216_s15, 3 }
  0x62   : > { %341 = vxpose.xlu0.b32.cont [3/8] (short) %v333_v10, 128  ;;  %1763 = vmatpush3.msra.mxu0 %v449_v15  ;;  %396 = vst.msk [vmem:[#allocation3 + $0x38] sm:$0xff] %vm388_vm1, %v2239_v0  ;;  %397 = vst.msk [vmem:[#allocation3 + $0x40] sm:$0xff] %vm388_vm1, %v2239_v0  ;;  %v2591_v22 = vld [vmem:[#allocation3 + $0x8] sm:$0xff]  ;;  %v1004_v25 = vld [vmem:[%s2586_s20 + $0x20] sm:$0xff]  ;;  %s1704_s9 = sshll.u32 %s2220_s16, 4  ;;  %s1517_s24 = sshll.u32 %s318_s27, 4  ;;  %s2899_s24 = int_to_ptr.vmem [resolvable:$true] %s1517_s24 }
  0x63   : > { %1764 = vmatprep.subr.mxu0 %v448_v18  ;;  %398 = vst.msk [vmem:[#allocation3 + $0x48] sm:$0xff] %vm388_vm1, %v2239_v0  ;;  %399 = vst.msk [vmem:[#allocation3 + $0x50] sm:$0xff] %vm388_vm1, %v2239_v0  ;;  %1836 = vmatprep.subr.mxu1 %v1007_v19  ;;  %v1003_v30 = vld [vmem:[%s2586_s20 + $0x18] sm:$0xff]  ;;  %s1514_s23 = sadd.s32 %s1704_s9, %s1703_s18  ;;  %s1501_s15 = scalar_lea.sflag [#allocation8], %s2420_s17 }
  0x64   : > { %1765 = vmatpush3.msra.mxu0 %v448_v18  ;;  %400 = vst.msk [vmem:[#allocation3 + $0x58] sm:$0xff] %vm388_vm1, %v2239_v0  ;;  %401 = vst.msk [vmem:[#allocation3 + $0x60] sm:$0xff] %vm388_vm1, %v2239_v0  ;;  %1844 = vmatpush3.xpose.msra.mxu1 %v1007_v19  ;;  %s1705_s1 = sshll.u32 %s1514_s23, 7  ;;  %s2132_s16 = scalar_lea.vmem %s2899_s24, 1024 }
  0x65   : > { %1766 = vmatprep.subr.mxu0 %v447_v21  ;;  %402 = vst.msk [vmem:[#allocation3 + $0x68] sm:$0xff] %vm388_vm1, %v2239_v0  ;;  %403 = vst.msk [vmem:[#allocation3 + $0x70] sm:$0xff] %vm388_vm1, %v2239_v0  ;;  %1837 = vmatprep.subr.mxu1 %v1006_v20  ;;  %s2904_s29 = scalar_lea.hbm %s2960_s3, %s1705_s1  ;;  %p2133_p8 = scmp.ne.s32.totalorder %s2899_s24, %s2132_s16 }
  0x66   : > { %342 = vxpose.xlu0.b32.cont [4/8] (short) %v334_v17, 128  ;;  %1767 = vmatpush3.msra.mxu0 %v447_v21  ;;  %404 = vst.msk [vmem:[#allocation3 + $0x78] sm:$0xff] %vm388_vm1, %v2239_v0  ;;  %406 = vst.msk [vmem:[#allocation4 + $0x8] sm:$0xff] %vm388_vm1, %v2241_v8  ;;  %v1005_v21 = vld [vmem:[%s2586_s20 + $0x28] sm:$0xff]  ;;  %s2242_s8 = smov [#allocation12]  }
  0x67   : > { %1768 = vmatprep.subr.mxu0 %v446_v24  ;;  %405 = vst.msk [vmem:[#allocation4] sm:$0xff] %vm388_vm1, %v2241_v8  ;;  %407 = vst.msk [vmem:[#allocation4 + $0x10] sm:$0xff] %vm388_vm1, %v2241_v8  ;;  %p2134_p0 = pnand %p2133_p8, %p2334_p9  ;;  %s2136_s5 = sshll.u32 %s2242_s8, 4  ;;  %s2137_s5 = int_to_ptr.vmem [resolvable:$false] %s2136_s5 }
  0x68   : > { %1769 = vmatpush3.msra.mxu0 %v446_v24  ;;  %408 = vst.msk [vmem:[#allocation4 + $0x18] sm:$0xff] %vm388_vm1, %v2241_v8  ;;  %409 = vst.msk [vmem:[#allocation4 + $0x20] sm:$0xff] %vm388_vm1, %v2241_v8  ;;  %1845 = vmatpush3.xpose.msra.mxu1 %v1006_v20  ;;  %s2138_s11 = scalar_lea.vmem %s2137_s5, 2048  ;;  %p2139_p2 = scmp.lt.s32.totalorder %s2899_s24, %s2137_s5 }
  0x69   : > { %1770 = vmatprep.subr.mxu0 %v445_v26  ;;  %410 = vst.msk [vmem:[#allocation4 + $0x28] sm:$0xff] %vm388_vm1, %v2241_v8  ;;  %411 = vst.msk [vmem:[#allocation4 + $0x30] sm:$0xff] %vm388_vm1, %v2241_v8  ;;  %1838 = vmatprep.subr.mxu1 %v1005_v21  ;;  %p2135_p1 = pneg %p2134_p0  ;;  %p2140_p11 = scmp.lt.s32.totalorder %s2138_s11, %s2132_s16 }
  0x6a   : > { %343 = vxpose.xlu0.b32.cont [5/8] (short) %v335_v23, 128  ;;  %1771 = vmatpush3.msra.mxu0 %v445_v26  ;;  %412 = vst.msk [vmem:[#allocation4 + $0x38] sm:$0xff] %vm388_vm1, %v2241_v8  ;;  %413 = vst.msk [vmem:[#allocation4 + $0x40] sm:$0xff] %vm388_vm1, %v2241_v8  ;;  %v2597_v26 = vld [vmem:[#allocation3] sm:$0xff] }
  0x6b   : > { %414 = vst.msk [vmem:[#allocation4 + $0x48] sm:$0xff] %vm388_vm1, %v2241_v8  ;;  %415 = vst.msk [vmem:[#allocation4 + $0x50] sm:$0xff] %vm388_vm1, %v2241_v8  ;;  %1796 = vmatprep.subr.mxu0 %v1007_v19  ;;  %p2141_p13 = por %p2140_p11, %p2139_p2 }
  0x6c   : > { %416 = vst.msk [vmem:[#allocation4 + $0x58] sm:$0xff] %vm388_vm1, %v2241_v8  ;;  %417 = vst.msk [vmem:[#allocation4 + $0x60] sm:$0xff] %vm388_vm1, %v2241_v8  ;;  %1846 = vmatpush3.xpose.msra.mxu1 %v1005_v21 }
  0x6d   : > { %418 = vst.msk [vmem:[#allocation4 + $0x68] sm:$0xff] %vm388_vm1, %v2241_v8  ;;  %419 = vst.msk [vmem:[#allocation4 + $0x70] sm:$0xff] %vm388_vm1, %v2241_v8  ;;  %1839 = vmatprep.subr.mxu1 %v1004_v25  ;;  %p2142_p3 = pnand %p2141_p13, %p2135_p1 }
  0x6e   : > { %344 = vxpose.xlu0.b32.cont [6/8] (short) %v336_v27, 128  ;;  %420 = vst.msk [vmem:[#allocation4 + $0x78] sm:$0xff] %vm388_vm1, %v2241_v8 }
  0x6f   : > { %421 = vst.msk [vmem:[#allocation5] sm:$0xff] %vm371_vm0, %v2241_v8  ;;  %422 = vst.msk [vmem:[#allocation5 + $0x8] sm:$0xff] %vm371_vm0, %v2241_v8 }
  0x70   : > { %423 = vst.msk [vmem:[#allocation5 + $0x10] sm:$0xff] %vm371_vm0, %v2241_v8  ;;  %424 = vst.msk [vmem:[#allocation5 + $0x18] sm:$0xff] %vm371_vm0, %v2241_v8  ;;  %1847 = vmatpush3.xpose.msra.mxu1 %v1004_v25 }
  0x71   : > { %425 = vst.msk [vmem:[#allocation5 + $0x20] sm:$0xff] %vm371_vm0, %v2241_v8  ;;  %426 = vst.msk [vmem:[#allocation5 + $0x28] sm:$0xff] %vm371_vm0, %v2241_v8  ;;  %1840 = vmatprep.subr.mxu1 %v1003_v30 }
  0x72   : > { %345 = vxpose.xlu0.b32.cont [7/8] (short) %v337_v29, 128  ;;  %427 = vst.msk [vmem:[#allocation5 + $0x30] sm:$0xff] %vm371_vm0, %v2241_v8  ;;  %428 = vst.msk [vmem:[#allocation5 + $0x38] sm:$0xff] %vm371_vm0, %v2241_v8 }
  0x73   : > { %429 = vst.msk [vmem:[#allocation5 + $0x40] sm:$0xff] %vm371_vm0, %v2241_v8  ;;  %430 = vst.msk [vmem:[#allocation5 + $0x48] sm:$0xff] %vm371_vm0, %v2241_v8 }
  0x74   : > { %431 = vst.msk [vmem:[#allocation5 + $0x50] sm:$0xff] %vm371_vm0, %v2241_v8  ;;  %432 = vst.msk [vmem:[#allocation5 + $0x58] sm:$0xff] %vm371_vm0, %v2241_v8  ;;  %1848 = vmatpush3.xpose.msra.mxu1 %v1003_v30 }
  0x75   : > { %433 = vst.msk [vmem:[#allocation5 + $0x60] sm:$0xff] %vm371_vm0, %v2241_v8  ;;  %434 = vst.msk [vmem:[#allocation5 + $0x68] sm:$0xff] %vm371_vm0, %v2241_v8 }
  0x76   : > { %346 = vxpose.xlu0.b32.end [8/8] (short) %v338_v31, 128  ;;  %435 = vst.msk [vmem:[#allocation5 + $0x70] sm:$0xff] %vm371_vm0, %v2241_v8  ;;  %436 = vst.msk [vmem:[#allocation5 + $0x78] sm:$0xff] %vm371_vm0, %v2241_v8  ;;  %v2608_v31 = vld [vmem:[#allocation3 + $0x18] sm:$0xff] }
  0x9f   : > { %1949 = vset.pattern.permute.xlu0 %v2240_v5 }
  0xd6   : > { %v355_v32 = vpop.trf.xlu0 }
  0xd7   : > { %372 = vst.msk [vmem:[#allocation2] sm:$0xff] %vm371_vm0, %v355_v32 }
  0xda   : > { %v356_v33 = vpop.trf.xlu0 }
  0xdb   : > { %373 = vst.msk [vmem:[#allocation2 + $0x8] sm:$0xff] %vm371_vm0, %v356_v33 }
  0xde   : > { %v357_v34 = vpop.trf.xlu0  ;;  %v453_v35 = vld [vmem:[#allocation2] sm:$0xff] }
  0xdf   : > { %374 = vst.msk [vmem:[#allocation2 + $0x10] sm:$0xff] %vm371_vm0, %v357_v34  ;;  %1772 = vmatprep.mubr.msk.f32.mxu0 %vm371_vm0, %v453_v35  ;;  %v1002_v35 = vld [vmem:[%s2586_s20 + $0x10] sm:$0xff] }
  0xe0   : > { %1841 = vmatprep.subr.mxu1 %v1002_v35 }
  0xe1   : > { %1849 = vmatpush3.xpose.msra.mxu1 %v1002_v35 }
  0xe2   : > { %v358_v36 = vpop.trf.xlu0  ;;  %v454_v37 = vld [vmem:[#allocation2 + $0x8] sm:$0xff] }
  0xe3   : > { %375 = vst.msk [vmem:[#allocation2 + $0x18] sm:$0xff] %vm371_vm0, %v358_v36  ;;  %1773 = vmatmul.mubr.msk.f32.vlgmr.msra.gmra.mxu0 %vm371_vm0, %v454_v37  ;;  %v2619_v36 = vld [vmem:[#allocation3 + $0x10] sm:$0xff] }
  0xe4   : > { %1797 = vmatpush3.xpose.msra.mxu0 %v1007_v19  ;;  %v2696_v19 = vld [vmem:[#allocation3 + $0x58] sm:$0xff] }
  0xe5   : > { %1798 = vmatprep.subr.mxu0 %v1006_v20 }
  0xe6   : > { %v359_v38 = vpop.trf.xlu0  ;;  %v455_v39 = vld [vmem:[#allocation2 + $0x10] sm:$0xff] }
  0xe7   : > { %376 = vst.msk [vmem:[#allocation2 + $0x20] sm:$0xff] %vm371_vm0, %v359_v38  ;;  %1775 = vmatprep.mubr.msk.f32.mxu0 %vm371_vm0, %v455_v39 }
  0xe8   : > { %1799 = vmatpush3.xpose.msra.mxu0 %v1006_v20 }
  0xe9   : > { %1800 = vmatprep.subr.mxu0 %v1005_v21 }
  0xea   : > { %v360_v40 = vpop.trf.xlu0  ;;  %v456_v41 = vld [vmem:[#allocation2 + $0x18] sm:$0xff] }
  0xeb   : > { %377 = vst.msk [vmem:[#allocation2 + $0x28] sm:$0xff] %vm371_vm0, %v360_v40  ;;  %1776 = vmatmul.mubr.msk.f32.gmra.mxu0 %vm371_vm0, %v456_v41  ;;  %v1001_v40 = vld [vmem:[%s2586_s20 + $0x8] sm:$0xff] }
  0xec   : > { %1801 = vmatpush3.xpose.msra.mxu0 %v1005_v21  ;;  %v2630_v41 = vld [vmem:[#allocation3 + $0x28] sm:$0xff]  ;;  %1842 = vmatprep.subr.mxu1 %v1001_v40 }
  0xed   : > { %1802 = vmatprep.subr.mxu0 %v1004_v25  ;;  %1850 = vmatpush3.xpose.msra.mxu1 %v1001_v40 }
  0xee   : > { %v361_v42 = vpop.trf.xlu0  ;;  %v457_v43 = vld [vmem:[#allocation2 + $0x20] sm:$0xff] }
  0xef   : > { %378 = vst.msk [vmem:[#allocation2 + $0x30] sm:$0xff] %vm371_vm0, %v361_v42  ;;  %1778 = vmatprep.mubr.msk.f32.mxu0 %vm371_vm0, %v457_v43 }
  0xf0   : > { %1803 = vmatpush3.xpose.msra.mxu0 %v1004_v25 }
  0xf1   : > { %1804 = vmatprep.subr.mxu0 %v1003_v30 }
  0xf2   : > { %v362_v44 = vpop.trf.xlu0  ;;  %v458_v45 = vld [vmem:[#allocation2 + $0x28] sm:$0xff] }
  0xf3   : > { %379 = vst.msk [vmem:[#allocation2 + $0x38] sm:$0xff] %vm371_vm0, %v362_v44  ;;  %1779 = vmatmul.mubr.msk.f32.gmra.mxu0 %vm371_vm0, %v458_v45  ;;  %v1000_v45 = vld [vmem:[%s2586_s20] sm:$0xff] }
  0xf4   : > { %1805 = vmatpush3.xpose.msra.mxu0 %v1003_v30  ;;  %1843 = vmatprep.subr.mxu1 %v1000_v45 }
  0xf5   : > { %1806 = vmatprep.subr.mxu0 %v1002_v35  ;;  %1851 = vmatpush3.xpose.msra.mxu1 %v1000_v45 }
  0xf6   : > { %v363_v46 = vpop.trf.xlu0  ;;  %v459_v47 = vld [vmem:[#allocation2 + $0x30] sm:$0xff] }
  0xf7   : > { %380 = vst.msk [vmem:[#allocation2 + $0x40] sm:$0xff] %vm371_vm0, %v363_v46  ;;  %1781 = vmatprep.mubr.msk.f32.mxu0 %vm371_vm0, %v459_v47  ;;  %v2641_v46 = vld [vmem:[#allocation3 + $0x20] sm:$0xff] }
  0xf8   : > { %1807 = vmatpush3.xpose.msra.mxu0 %v1002_v35 }
  0xf9   : > { %1808 = vmatprep.subr.mxu0 %v1001_v40 }
  0xfa   : > { %v364_v48 = vpop.trf.xlu0  ;;  %v460_v49 = vld [vmem:[#allocation2 + $0x38] sm:$0xff] }
  0xfb   : > { %381 = vst.msk [vmem:[#allocation2 + $0x48] sm:$0xff] %vm371_vm0, %v364_v48  ;;  %1782 = vmatmul.mubr.msk.f32.gmra.mxu0 %vm371_vm0, %v460_v49 }
  0xfc   : > { %1809 = vmatpush3.xpose.msra.mxu0 %v1001_v40 }
  0xfd   : > { %1810 = vmatprep.subr.mxu0 %v1000_v45 }
  0xfe   : > { %v365_v50 = vpop.trf.xlu0  ;;  %v461_v51 = vld [vmem:[#allocation2 + $0x40] sm:$0xff] }
  0xff   : > { %382 = vst.msk [vmem:[#allocation2 + $0x50] sm:$0xff] %vm371_vm0, %v365_v50  ;;  %1784 = vmatprep.mubr.msk.f32.mxu0 %vm371_vm0, %v461_v51  ;;  %v2651_v50 = vld [vmem:[#allocation3 + $0x38] sm:$0xff] }
 0x100   : > { %1811 = vmatpush3.xpose.msra.mxu0 %v1000_v45 }
 0x102   : > { %v366_v52 = vpop.trf.xlu0  ;;  %v462_v53 = vld [vmem:[#allocation2 + $0x48] sm:$0xff] }
 0x103   : > { %383 = vst.msk [vmem:[#allocation2 + $0x58] sm:$0xff] %vm371_vm0, %v366_v52  ;;  %1785 = vmatmul.mubr.msk.f32.gmra.mxu0 %vm371_vm0, %v462_v53 }
 0x106   : > { %v367_v54 = vpop.trf.xlu0  ;;  %v463_v55 = vld [vmem:[#allocation2 + $0x50] sm:$0xff] }
 0x107   : > { %384 = vst.msk [vmem:[#allocation2 + $0x60] sm:$0xff] %vm371_vm0, %v367_v54  ;;  %1787 = vmatprep.mubr.msk.f32.mxu0 %vm371_vm0, %v463_v55  ;;  %v2661_v54 = vld [vmem:[#allocation3 + $0x30] sm:$0xff] }
 0x10a   : > { %v368_v56 = vpop.trf.xlu0  ;;  %v464_v57 = vld [vmem:[#allocation2 + $0x58] sm:$0xff] }
 0x10b   : > { %385 = vst.msk [vmem:[#allocation2 + $0x68] sm:$0xff] %vm371_vm0, %v368_v56  ;;  %1788 = vmatmul.mubr.msk.f32.gmra.mxu0 %vm371_vm0, %v464_v57 }
 0x10e   : > { %v369_v58 = vpop.trf.xlu0  ;;  %v465_v59 = vld [vmem:[#allocation2 + $0x60] sm:$0xff] }
 0x10f   : > { %386 = vst.msk [vmem:[#allocation2 + $0x70] sm:$0xff] %vm371_vm0, %v369_v58  ;;  %1790 = vmatprep.mubr.msk.f32.mxu0 %vm371_vm0, %v465_v59  ;;  %v2671_v58 = vld [vmem:[#allocation3 + $0x48] sm:$0xff] }
 0x112   : > { %v370_v60 = vpop.trf.xlu0  ;;  %v466_v61 = vld [vmem:[#allocation2 + $0x68] sm:$0xff] }
 0x113   : > { %387 = vst.msk [vmem:[#allocation2 + $0x78] sm:$0xff] %vm371_vm0, %v370_v60  ;;  %1791 = vmatmul.mubr.msk.f32.gmra.mxu0 %vm371_vm0, %v466_v61  ;;  %v2678_v61 = vld [vmem:[#allocation3 + $0x40] sm:$0xff] }
 0x116   : > { %v467_v62 = vld [vmem:[#allocation2 + $0x70] sm:$0xff] }
 0x117   : > { %1793 = vmatprep.mubr.msk.f32.mxu0 %vm371_vm0, %v467_v62 }
 0x11a   : > { %v468_v63 = vld [vmem:[#allocation2 + $0x78] sm:$0xff] }
 0x11b   : > { %1794 = vmatmul.mubr.msk.f32.gmra.mxu0 %vm371_vm0, %v468_v63 }
 0x1a3   : > { %v2505_v1 = vpop.f32.mrf.mxu0 }
 0x1a4   : > { %681 = vmax.xlane.f32.xlu1 %v2505_v1 }
 0x1a5   : > { %v2508_v2 = vpop.f32.mrf.mxu0 }
 0x1a8   : > { %679 = vmax.xlane.f32.xlu1 %v2508_v2 }
 0x1ab   : > { %v2511_v3 = vpop.f32.mrf.mxu0 }
 0x1ac   : > { %685 = vmax.xlane.f32.xlu1 %v2511_v3 }
 0x1ad   : > { %v2514_v4 = vpop.f32.mrf.mxu0 }
 0x1b0   : > { %683 = vmax.xlane.f32.xlu1 %v2514_v4 }
 0x1b3   : > { %v2517_v6 = vpop.f32.mrf.mxu0 }
 0x1b4   : > { %689 = vmax.xlane.f32.xlu1 %v2517_v6 }
 0x1b5   : > { %v2520_v7 = vpop.f32.mrf.mxu0 }
 0x1b8   : > { %687 = vmax.xlane.f32.xlu1 %v2520_v7 }
 0x1bb   : > { %v2555_v9 = vpop.f32.mrf.mxu0 }
 0x1bc   : > { %693 = vmax.xlane.f32.xlu1 %v2555_v9 }
 0x1bd   : > { %v2558_v10 = vpop.f32.mrf.mxu0 }
 0x1c0   : > { %691 = vmax.xlane.f32.xlu1 %v2558_v10 }
 0x1c3   : > { %v2561_v11 = vpop.f32.mrf.mxu0 }
 0x1c4   : > { %697 = vmax.xlane.f32.xlu1 %v2561_v11 }
 0x1c5   : > { %v2564_v12 = vpop.f32.mrf.mxu0 }
 0x1c6   : > { %695 = vmax.xlane.f32.xlu0 %v2564_v12 }
 0x1cb   : > { %v2567_v13 = vpop.f32.mrf.mxu0 }
 0x1cc   : > { %701 = vmax.xlane.f32.xlu1 %v2567_v13 }
 0x1cd   : > { %v2570_v14 = vpop.f32.mrf.mxu0 }
 0x1d0   : > { %699 = vmax.xlane.f32.xlu1 %v2570_v14 }
 0x1d3   : > { %v2573_v15 = vpop.f32.mrf.mxu0 }
 0x1d4   : > { %705 = vmax.xlane.f32.xlu1 %v2573_v15 }
 0x1d5   : > { %v2576_v16 = vpop.f32.mrf.mxu0 }
 0x1d8   : > { %703 = vmax.xlane.f32.xlu1 %v2576_v16 }
 0x1db   : > { %v2579_v17 = vpop.f32.mrf.mxu0 }
 0x1dc   : > { %709 = vmax.xlane.f32.xlu1 %v2579_v17 }
 0x1dd   : > { %v2582_v18 = vpop.f32.mrf.mxu0 }
 0x1e0   : > { %707 = vmax.xlane.f32.xlu1 %v2582_v18 }
 0x22d   : > { %v682_v23 = vpop.xlane.xlu1 %681 }
 0x22e   : > { %v2594_v24 = vmax.f32 %v2591_v22, %v682_v23  ;;  %v2701_v23 = vld [vmem:[#allocation3 + $0x50] sm:$0xff] }
 0x230   : > { %v728_v27 = vsub.f32 %v2591_v22, %v2594_v24  ;;  %1298 = vst.msk [vmem:[#allocation3 + $0x8] sm:$0xff] %vm388_vm1, %v2594_v24  ;;  %782 = vperm.xlu1 %1948, %v2594_v24  }
 0x231   : > { %v680_v28 = vpop.xlane.xlu1 %679 }
 0x232   : > { %v2605_v29 = vmax.f32 %v2597_v26, %v680_v28 }
 0x234   : > { %v727_v32 = vsub.f32 %v2597_v26, %v2605_v29  ;;  %1297 = vst.msk [vmem:[#allocation3] sm:$0xff] %vm388_vm1, %v2605_v29  ;;  %777 = vperm.xlu1 %1948, %v2605_v29  }
 0x235   : > { %v686_v33 = vpop.xlane.xlu1 %685 }
 0x236   : > { %v2616_v34 = vmax.f32 %v2608_v31, %v686_v33  ;;  %v2711_v33 = vld [vmem:[#allocation3 + $0x68] sm:$0xff] }
 0x238   : > { %1300 = vst.msk [vmem:[#allocation3 + $0x18] sm:$0xff] %vm388_vm1, %v2616_v34  ;;  %792 = vperm.xlu1 %1948, %v2616_v34  }
 0x239   : > { %v684_v38 = vpop.xlane.xlu1 %683 }
 0x23a   : > { %v2627_v39 = vmax.f32 %v2619_v36, %v684_v38 }
 0x23c   : > { %v729_v42 = vsub.f32 %v2619_v36, %v2627_v39  ;;  %1299 = vst.msk [vmem:[#allocation3 + $0x10] sm:$0xff] %vm388_vm1, %v2627_v39  ;;  %787 = vperm.xlu1 %1948, %v2627_v39  }
 0x23d   : > { %v690_v43 = vpop.xlane.xlu1 %689 }
 0x23e   : > { %v2638_v44 = vmax.f32 %v2630_v41, %v690_v43  ;;  %v2721_v43 = vld [vmem:[#allocation3 + $0x60] sm:$0xff] }
 0x240   : > { %1302 = vst.msk [vmem:[#allocation3 + $0x28] sm:$0xff] %vm388_vm1, %v2638_v44  ;;  %802 = vperm.xlu1 %1948, %v2638_v44   ;;  %v2987_v26 = vsub.f32 %v2630_v41, %v2638_v44 }
 0x241   : > { %v688_v48 = vpop.xlane.xlu1 %687 }
 0x242   : > { %v2649_v49 = vmax.f32 %v2641_v46, %v688_v48 }
 0x244   : > { %1301 = vst.msk [vmem:[#allocation3 + $0x20] sm:$0xff] %vm388_vm1, %v2649_v49  ;;  %797 = vperm.xlu1 %1948, %v2649_v49   ;;  %v2986_v22 = vsub.f32 %v2641_v46, %v2649_v49 }
 0x245   : > { %v694_v52 = vpop.xlane.xlu1 %693 }
 0x246   : > { %v2659_v53 = vmax.f32 %v2651_v50, %v694_v52  ;;  %v751_v24 = vmul.f32 1.442695, %v2986_v22 }
 0x248   : > { %1304 = vst.msk [vmem:[#allocation3 + $0x38] sm:$0xff] %vm388_vm1, %v2659_v53  ;;  %812 = vperm.xlu1 %1948, %v2659_v53  }
 0x249   : > { %v692_v56 = vpop.xlane.xlu1 %691 }
 0x24a   : > { %v2669_v57 = vmax.f32 %v2661_v54, %v692_v56  ;;  %v2731_v56 = vld [vmem:[#allocation3 + $0x78] sm:$0xff] }
 0x24c   : > { %1303 = vst.msk [vmem:[#allocation3 + $0x30] sm:$0xff] %vm388_vm1, %v2669_v57  ;;  %807 = vperm.xlu1 %1948, %v2669_v57   ;;  %v2988_v29 = vsub.f32 %v2661_v54, %v2669_v57 }
 0x24d   : > { %v698_v60 = vpop.xlane.xlu1 %697 }
 0x24e   : > { %v2681_v62 = vmax.f32 %v2671_v58, %v698_v60 }
 0x24f   : > { %v696_v63 = vpop.xlane.xlu0 %695 }
 0x250   : > { %1306 = vst.msk [vmem:[#allocation3 + $0x48] sm:$0xff] %vm388_vm1, %v2681_v62  ;;  %v2688_v5 = vmax.f32 %v2678_v61, %v696_v63  ;;  %822 = vperm.xlu0 %1949, %v2681_v62   ;;  %v2991_v41 = vsub.f32 %v2671_v58, %v2681_v62 }
 0x252   : > { %1305 = vst.msk [vmem:[#allocation3 + $0x40] sm:$0xff] %vm388_vm1, %v2688_v5  ;;  %817 = vperm.xlu1 %1948, %v2688_v5   ;;  %v2990_v36 = vsub.f32 %v2678_v61, %v2688_v5  ;;  %v761_v44 = vmul.f32 1.442695, %v2991_v41 }
 0x254   : > { %v759_v39 = vmul.f32 1.442695, %v2990_v36  ;;  %v909_v36 = vld [vmem:[#allocation4 + $0x30] sm:$0xff] }
 0x255   : > { %v702_v20 = vpop.xlane.xlu1 %701 }
 0x256   : > { %v2699_v21 = vmax.f32 %v2696_v19, %v702_v20 }
 0x258   : > { %1308 = vst.msk [vmem:[#allocation3 + $0x58] sm:$0xff] %vm388_vm1, %v2699_v21  ;;  %832 = vperm.xlu1 %1948, %v2699_v21   ;;  %v2993_v58 = vsub.f32 %v2696_v19, %v2699_v21 }
 0x259   : > { %v700_v28 = vpop.xlane.xlu1 %699 }
 0x25a   : > { %v2709_v30 = vmax.f32 %v2701_v23, %v700_v28  ;;  %v2741_v28 = vld [vmem:[#allocation3 + $0x70] sm:$0xff]  ;;  %v765_v62 = vmul.f32 1.442695, %v2993_v58 }
 0x25c   : > { %1307 = vst.msk [vmem:[#allocation3 + $0x50] sm:$0xff] %vm388_vm1, %v2709_v30  ;;  %827 = vperm.xlu1 %1948, %v2709_v30  }
 0x25d   : > { %v706_v38 = vpop.xlane.xlu1 %705 }
 0x25e   : > { %v2719_v40 = vmax.f32 %v2711_v33, %v706_v38 }
 0x260   : > { %1310 = vst.msk [vmem:[#allocation3 + $0x68] sm:$0xff] %vm388_vm1, %v2719_v40  ;;  %842 = vperm.xlu1 %1948, %v2719_v40   ;;  %v2995_v19 = vsub.f32 %v2711_v33, %v2719_v40 }
 0x261   : > { %v704_v48 = vpop.xlane.xlu1 %703 }
 0x262   : > { %v2729_v52 = vmax.f32 %v2721_v43, %v704_v48  ;;  %v769_v21 = vmul.f32 1.442695, %v2995_v19 }
 0x264   : > { %1309 = vst.msk [vmem:[#allocation3 + $0x60] sm:$0xff] %vm388_vm1, %v2729_v52  ;;  %837 = vperm.xlu1 %1948, %v2729_v52  }
 0x265   : > { %v710_v63 = vpop.xlane.xlu1 %709 }
 0x266   : > { %v2739_v20 = vmax.f32 %v2731_v56, %v710_v63 }
 0x268   : > { %1312 = vst.msk [vmem:[#allocation3 + $0x78] sm:$0xff] %vm388_vm1, %v2739_v20 }
 0x269   : > { %v708_v48 = vpop.xlane.xlu1 %707 }
 0x26a   : > { %v2748_v45 = vmax.f32 %v2741_v28, %v708_v48 }
 0x26c   : > { %1311 = vst.msk [vmem:[#allocation3 + $0x70] sm:$0xff] %vm388_vm1, %v2748_v45  ;;  %847 = vperm.xlu1 %1948, %v2748_v45  }
 0x270   : > { %852 = vperm.xlu1 %1948, %v2739_v20  }
 0x2ab   : > { %v783_v63 = vpop.permute.xlu1 %782 }
 0x2ac   : > { %v856_v38 = vsub.f32 %v2505_v1, %v783_v63 }
 0x2ae   : > { %v873_v25 = vmul.f32 1.442695, %v856_v38 }
 0x2af   : > { %v778_v35 = vpop.permute.xlu1 %777 }
 0x2b0   : > { %1950 = vpow2.f32 %v873_v25  ;;  %v855_v0 = vsub.f32 %v2508_v2, %v778_v35 }
 0x2b2   : > { %v871_v48 = vmul.f32 1.442695, %v855_v0 }
 0x2b3   : > { %v793_v8 = vpop.permute.xlu1 %792 }
 0x2b4   : > { %1952 = vpow2.f32 %v871_v48  ;;  %v858_v60 = vsub.f32 %v2511_v3, %v793_v8 }
 0x2b6   : > { %v877_v55 = vmul.f32 1.442695, %v858_v60 }
 0x2b7   : > { %v788_v59 = vpop.permute.xlu1 %787 }
 0x2b8   : > { %1954 = vpow2.f32 %v877_v55  ;;  %v857_v47 = vsub.f32 %v2514_v4, %v788_v59 }
 0x2ba   : > { %v875_v51 = vmul.f32 1.442695, %v857_v47 }
 0x2bb   : > { %v803_v37 = vpop.permute.xlu1 %802 }
 0x2bc   : > { %1956 = vpow2.f32 %v875_v51  ;;  %v860_v1 = vsub.f32 %v2517_v6, %v803_v37 }
 0x2bd   : > { %v1951_v38 = vpop.eup %1950 }
 0x2be   : > { %v881_v63 = vmul.f32 1.442695, %v860_v1  ;;  %937 = vadd.xlane.f32.xlu0 %v1951_v38 }
 0x2bf   : > { %v798_v25 = vpop.permute.xlu1 %797 }
 0x2c0   : > { %1958 = vpow2.f32 %v881_v63  ;;  %v859_v2 = vsub.f32 %v2520_v7, %v798_v25 }
 0x2c1   : > { %v1953_v0 = vpop.eup %1952 }
 0x2c2   : > { %v879_v35 = vmul.f32 1.442695, %v859_v2  ;;  %1812 = vmatprep.mubr.f32.mxu0 %v1953_v0  ;;  %935 = vadd.xlane.f32.xlu1 %v1953_v0 }
 0x2c3   : > { %1813 = vmatmul.mubr.f32.vlgmr.msra.gmra.mxu0 %v1951_v38  ;;  %v813_v3 = vpop.permute.xlu1 %812 }
 0x2c4   : > { %1960 = vpow2.f32 %v879_v35  ;;  %v862_v4 = vsub.f32 %v2555_v9, %v813_v3 }
 0x2c5   : > { %v1955_v47 = vpop.eup %1954 }
 0x2c6   : > { %v885_v51 = vmul.f32 1.442695, %v862_v4  ;;  %941 = vadd.xlane.f32.xlu1 %v1955_v47 }
 0x2c7   : > { %v808_v6 = vpop.permute.xlu1 %807 }
 0x2c8   : > { %1962 = vpow2.f32 %v885_v51  ;;  %v861_v37 = vsub.f32 %v2558_v10, %v808_v6 }
 0x2c9   : > { %v1957_v55 = vpop.eup %1956 }
 0x2ca   : > { %v883_v59 = vmul.f32 1.442695, %v861_v37  ;;  %1815 = vmatprep.mubr.f32.mxu0 %v1957_v55  ;;  %939 = vadd.xlane.f32.xlu1 %v1957_v55 }
 0x2cb   : > { %1816 = vmatmul.mubr.f32.gmra.mxu0 %v1955_v47  ;;  %v823_v7 = vpop.permute.xlu0 %822 }
 0x2cc   : > { %1964 = vpow2.f32 %v883_v59  ;;  %v864_v8 = vsub.f32 %v2561_v11, %v823_v7 }
 0x2cd   : > { %v1959_v60 = vpop.eup %1958  ;;  %v818_v48 = vpop.permute.xlu1 %817 }
 0x2ce   : > { %v889_v1 = vmul.f32 1.442695, %v864_v8  ;;  %v863_v9 = vsub.f32 %v2564_v12, %v818_v48  ;;  %945 = vadd.xlane.f32.xlu1 %v1959_v60 }
 0x2d0   : > { %1966 = vpow2.f32 %v889_v1  ;;  %v887_v38 = vmul.f32 1.442695, %v863_v9 }
 0x2d1   : > { %v1961_v63 = vpop.eup %1960 }
 0x2d2   : > { %1968 = vpow2.f32 %v887_v38  ;;  %1818 = vmatprep.mubr.f32.mxu1 %v1961_v63  ;;  %943 = vadd.xlane.f32.xlu1 %v1961_v63 }
 0x2d3   : > { %1819 = vmatmul.mubr.f32.vlgmr.msra.gmra.mxu1 %v1959_v60  ;;  %v833_v10 = vpop.permute.xlu1 %832 }
 0x2d4   : > { %v866_v25 = vsub.f32 %v2567_v13, %v833_v10  ;;  %v745_v10 = vmul.f32 1.442695, %v728_v27  ;;  %v753_v27 = vmul.f32 1.442695, %v2987_v26  ;;  %v910_v26 = vld [vmem:[#allocation4 + $0x38] sm:$0xff] }
 0x2d5   : > { %v1963_v2 = vpop.eup %1962 }
 0x2d6   : > { %v893_v0 = vmul.f32 1.442695, %v866_v25  ;;  %949 = vadd.xlane.f32.xlu1 %v1963_v2  ;;  %v747_v25 = vmul.f32 1.442695, %v729_v42 }
 0x2d7   : > { %v828_v11 = vpop.permute.xlu1 %827 }
 0x2d8   : > { %1970 = vpow2.f32 %v893_v0  ;;  %v865_v35 = vsub.f32 %v2570_v14, %v828_v11 }
 0x2d9   : > { %v1965_v3 = vpop.eup %1964 }
 0x2da   : > { %v891_v12 = vmul.f32 1.442695, %v865_v35  ;;  %947 = vadd.xlane.f32.xlu0 %v1965_v3  ;;  %1821 = vmatprep.mubr.f32.mxu1 %v1965_v3 }
 0x2db   : > { %1822 = vmatmul.mubr.f32.gmra.mxu1 %v1963_v2  ;;  %v843_v4 = vpop.permute.xlu1 %842  ;;  %v2985_v2 = vsub.f32 %v2608_v31, %v2616_v34  ;;  %v2989_v31 = vsub.f32 %v2651_v50, %v2659_v53  ;;  %v2992_v50 = vsub.f32 %v2701_v23, %v2709_v30  ;;  %v2994_v23 = vsub.f32 %v2721_v43, %v2729_v52 }
 0x2dc   : > { %1972 = vpow2.f32 %v891_v12  ;;  %v868_v47 = vsub.f32 %v2573_v15, %v843_v4  ;;  %v2996_v12 = vsub.f32 %v2741_v28, %v2748_v45  ;;  %v2997_v52 = vsub.f32 %v2731_v56, %v2739_v20  ;;  %v904_v20 = vld [vmem:[#allocation4 + $0x8] sm:$0xff] }
 0x2dd   : > { %v1967_v51 = vpop.eup %1966  ;;  %v749_v0 = vmul.f32 1.442695, %v2985_v2  ;;  %v757_v34 = vmul.f32 1.442695, %v2989_v31  ;;  %v763_v53 = vmul.f32 1.442695, %v2992_v50 }
 0x2de   : > { %v897_v6 = vmul.f32 1.442695, %v868_v47  ;;  %953 = vadd.xlane.f32.xlu1 %v1967_v51  ;;  %v767_v30 = vmul.f32 1.442695, %v2994_v23  ;;  %v771_v4 = vmul.f32 1.442695, %v2996_v12 }
 0x2df   : > { %v1969_v13 = vpop.eup %1968  ;;  %v838_v37 = vpop.permute.xlu1 %837  ;;  %v773_v47 = vmul.f32 1.442695, %v2997_v52  ;;  %v911_v50 = vld [vmem:[#allocation4 + $0x40] sm:$0xff] }
 0x2e0   : > { %1974 = vpow2.f32 %v897_v6  ;;  %v867_v55 = vsub.f32 %v2576_v16, %v838_v37  ;;  %951 = vadd.xlane.f32.xlu0 %v1969_v13  ;;  %1824 = vmatprep.mubr.f32.mxu1 %v1969_v13  ;;  %v903_v13 = vld [vmem:[#allocation4] sm:$0xff] }
 0x2e1   : > { %1825 = vmatmul.mubr.f32.gmra.mxu1 %v1967_v51 }
 0x2e2   : > { %v895_v14 = vmul.f32 1.442695, %v867_v55 }
 0x2e4   : > { %1976 = vpow2.f32 %v895_v14 }
 0x2e5   : > { %v1971_v59 = vpop.eup %1970 }
 0x2e6   : > { %957 = vadd.xlane.f32.xlu1 %v1971_v59 }
 0x2e7   : > { %v848_v7 = vpop.permute.xlu1 %847 }
 0x2e8   : > { %v869_v8 = vsub.f32 %v2582_v18, %v848_v7 }
 0x2e9   : > { %v1973_v60 = vpop.eup %1972 }
 0x2ea   : > { %v899_v15 = vmul.f32 1.442695, %v869_v8  ;;  %955 = vadd.xlane.f32.xlu0 %v1973_v60  ;;  %1827 = vmatprep.mubr.f32.mxu1 %v1973_v60 }
 0x2eb   : > { %v853_v48 = vpop.permute.xlu1 %852  ;;  %1828 = vmatmul.mubr.f32.gmra.mxu1 %v1971_v59  ;;  %v906_v59 = vld [vmem:[#allocation4 + $0x18] sm:$0xff] }
 0x2ec   : > { %1978 = vpow2.f32 %v899_v15  ;;  %v870_v1 = vsub.f32 %v2579_v17, %v853_v48  ;;  %v743_v17 = vmul.f32 1.442695, %v727_v32  ;;  %v755_v32 = vmul.f32 1.442695, %v2988_v29  ;;  %v905_v15 = vld [vmem:[#allocation4 + $0x10] sm:$0xff] }
 0x2ed   : > { %v1975_v16 = vpop.eup %1974 }
 0x2ee   : > { %v901_v9 = vmul.f32 1.442695, %v870_v1  ;;  %961 = vadd.xlane.f32.xlu1 %v1975_v16 }
 0x2f0   : > { %1980 = vpow2.f32 %v901_v9 }
 0x2f1   : > { %v1977_v38 = vpop.eup %1976  ;;  %1982 = vpow2.f32 %v745_v10 }
 0x2f2   : > { %959 = vadd.xlane.f32.xlu0 %v1977_v38  ;;  %1830 = vmatprep.mubr.f32.mxu1 %v1977_v38  ;;  %1984 = vpow2.f32 %v743_v17  ;;  %v908_v38 = vld [vmem:[#allocation4 + $0x28] sm:$0xff] }
 0x2f3   : > { %1831 = vmatmul.mubr.f32.gmra.mxu1 %v1975_v16  ;;  %1986 = vpow2.f32 %v747_v25  ;;  %v907_v25 = vld [vmem:[#allocation4 + $0x20] sm:$0xff] }
 0x2f4   : > { %1988 = vpow2.f32 %v749_v0 }
 0x2f5   : > { %1990 = vpow2.f32 %v751_v24 }
 0x2f6   : > { %1992 = vpow2.f32 %v753_v27 }
 0x2f7   : > { %1994 = vpow2.f32 %v755_v32 }
 0x2f8   : > { %1996 = vpow2.f32 %v757_v34 }
 0x2f9   : > { %v1979_v63 = vpop.eup %1978  ;;  %1998 = vpow2.f32 %v759_v39 }
 0x2fa   : > { %963 = vadd.xlane.f32.xlu0 %v1979_v63  ;;  %1833 = vmatprep.mubr.f32.mxu1 %v1979_v63  ;;  %2000 = vpow2.f32 %v761_v44 }
 0x2fb   : > { %2002 = vpow2.f32 %v763_v53 }
 0x2fc   : > { %2004 = vpow2.f32 %v765_v62 }
 0x2fd   : > { %v1981_v18 = vpop.eup %1980  ;;  %2006 = vpow2.f32 %v767_v30 }
 0x2fe   : > { %965 = vadd.xlane.f32.xlu1 %v1981_v18  ;;  %1834 = vmatmul.mubr.f32.gmra.mxu1 %v1981_v18  ;;  %v1983_v42 = vpop.eup %1982  ;;  %2008 = vpow2.f32 %v769_v21  ;;  %v914_v21 = vld [vmem:[#allocation4 + $0x58] sm:$0xff] }
 0x2ff   : > { %v1985_v46 = vpop.eup %1984  ;;  %2010 = vpow2.f32 %v771_v4  ;;  %v920_v51 = vmul.f32 %v1983_v42, %v904_v20 }
 0x300   : > { %v1987_v49 = vpop.eup %1986  ;;  %2012 = vpow2.f32 %v773_v47  ;;  %v919_v55 = vmul.f32 %v1985_v46, %v903_v13  ;;  %v913_v47 = vld [vmem:[#allocation4 + $0x50] sm:$0xff]  ;;  %v916_v13 = vld [vmem:[#allocation4 + $0x68] sm:$0xff] }
 0x301   : > { %v1989_v54 = vpop.eup %1988  ;;  %v921_v16 = vmul.f32 %v1987_v49, %v905_v15 }
 0x302   : > { %v2805_v57 = vpop.eup %1990  ;;  %v922_v8 = vmul.f32 %v1989_v54, %v906_v59 }
 0x303   : > { %v1993_v61 = vpop.eup %1992  ;;  %v923_v22 = vmul.f32 %v2805_v57, %v907_v25 }
 0x304   : > { %v2811_v5 = vpop.eup %1994  ;;  %v924_v10 = vmul.f32 %v1993_v61, %v908_v38 }
 0x305   : > { %v2813_v11 = vpop.eup %1996 }
 0x306   : > { %v2820_v35 = vpop.eup %1998  ;;  %v926_v32 = vmul.f32 %v2813_v11, %v910_v26 }
 0x307   : > { %v2826_v3 = vpop.eup %2000 }
 0x308   : > { %v2832_v43 = vpop.eup %2002 }
 0x309   : > { %v2838_v33 = vpop.eup %2004 }
 0x30a   : > { %v2841_v40 = vpop.eup %2006 }
 0x30b   : > { %v2844_v45 = vpop.eup %2008 }
 0x30c   : > { %v2847_v28 = vpop.eup %2010 }
 0x30d   : > { %v2850_v56 = vpop.eup %2012 }
 0x30f   : > { %1176 = vperm.xlu1 %1948, %v1983_v42  }
 0x310   : > { %1171 = vperm.xlu0 %1949, %v1985_v46   ;;  %v925_v46 = vmul.f32 %v2811_v5, %v909_v36 }
 0x313   : > { %1181 = vperm.xlu1 %1948, %v1987_v49   ;;  %v912_v49 = vld [vmem:[#allocation4 + $0x48] sm:$0xff] }
 0x314   : > { %1186 = vperm.xlu0 %1949, %v1989_v54  }
 0x317   : > { %1191 = vperm.xlu1 %1948, %v2805_v57   ;;  %v928_v57 = vmul.f32 %v2826_v3, %v912_v49  ;;  %v1156_v49 = vld [vmem:[#allocation5 + $0x18] sm:$0xff] }
 0x318   : > { %1196 = vperm.xlu0 %1949, %v1993_v61  }
 0x31b   : > { %1201 = vperm.xlu1 %1948, %v2811_v5  }
 0x31c   : > { %1206 = vperm.xlu0 %1949, %v2813_v11   ;;  %v927_v11 = vmul.f32 %v2820_v35, %v911_v50 }
 0x31f   : > { %1211 = vperm.xlu1 %1948, %v2820_v35   ;;  %v929_v35 = vmul.f32 %v2832_v43, %v913_v47 }
 0x323   : > { %1216 = vperm.xlu1 %1948, %v2826_v3   ;;  %v930_v3 = vmul.f32 %v2838_v33, %v914_v21 }
 0x327   : > { %1221 = vperm.xlu1 %1948, %v2832_v43  }
 0x32b   : > { %1226 = vperm.xlu1 %1948, %v2838_v33   ;;  %v932_v33 = vmul.f32 %v2844_v45, %v916_v13  ;;  %v1160_v13 = vld [vmem:[#allocation5 + $0x38] sm:$0xff] }
 0x32f   : > { %1231 = vperm.xlu1 %1948, %v2841_v40  }
 0x333   : > { %1236 = vperm.xlu1 %1948, %v2844_v45   ;;  %v917_v45 = vld [vmem:[#allocation4 + $0x70] sm:$0xff] }
 0x337   : > { %1241 = vperm.xlu1 %1948, %v2847_v28  }
 0x33b   : > { %1246 = vperm.xlu1 %1948, %v2850_v56  }
 0x347   : > { %v938_v6 = vpop.xlane.xlu0 %937 }
 0x348   : > { %v968_v37 = vadd.f32 %v938_v6, %v920_v51 }
 0x34a   : > { %985 = vst.msk [vmem:[#allocation4 + $0x8] sm:$0xff] %vm388_vm1, %v968_v37 }
 0x34b   : > { %v936_v14 = vpop.xlane.xlu1 %935 }
 0x34c   : > { %v967_v7 = vadd.f32 %v936_v14, %v919_v55 }
 0x34e   : > { %984 = vst.msk [vmem:[#allocation4] sm:$0xff] %vm388_vm1, %v967_v7 }
 0x34f   : > { %v942_v60 = vpop.xlane.xlu1 %941 }
 0x350   : > { %v970_v48 = vadd.f32 %v942_v60, %v922_v8  ;;  %v915_v8 = vld [vmem:[#allocation4 + $0x60] sm:$0xff] }
 0x351   : > { %v1333_v1 = vld [vmem:[#allocation4 + $0x8] sm:$0xff]  ;;  %v931_v43 = vmul.f32 %v2841_v40, %v915_v8 }
 0x352   : > { %987 = vst.msk [vmem:[#allocation4 + $0x18] sm:$0xff] %vm388_vm1, %v970_v48  ;;  %2014 = vrcp.f32 %v1333_v1 }
 0x353   : > { %v940_v9 = vpop.xlane.xlu1 %939 }
 0x354   : > { %v969_v63 = vadd.f32 %v940_v9, %v921_v16 }
 0x355   : > { %v1332_v18 = vld [vmem:[#allocation4] sm:$0xff] }
 0x356   : > { %2016 = vrcp.f32 %v1332_v18  ;;  %986 = vst.msk [vmem:[#allocation4 + $0x10] sm:$0xff] %vm388_vm1, %v969_v63  ;;  %v933_v18 = vmul.f32 %v2847_v28, %v917_v45  ;;  %v1153_v28 = vld [vmem:[#allocation5] sm:$0xff] }
 0x357   : > { %v946_v17 = vpop.xlane.xlu1 %945 }
 0x358   : > { %v972_v2 = vadd.f32 %v946_v17, %v924_v10  ;;  %v918_v17 = vld [vmem:[#allocation4 + $0x78] sm:$0xff] }
 0x359   : > { %v1335_v0 = vld [vmem:[#allocation4 + $0x18] sm:$0xff] }
 0x35a   : > { %989 = vst.msk [vmem:[#allocation4 + $0x28] sm:$0xff] %vm388_vm1, %v972_v2  ;;  %2018 = vrcp.f32 %v1335_v0  ;;  %v934_v0 = vmul.f32 %v2850_v56, %v918_v17 }
 0x35b   : > { %v944_v24 = vpop.xlane.xlu1 %943 }
 0x35c   : > { %v971_v27 = vadd.f32 %v944_v24, %v923_v22 }
 0x35d   : > { %v1334_v29 = vld [vmem:[#allocation4 + $0x10] sm:$0xff] }
 0x35e   : > { %988 = vst.msk [vmem:[#allocation4 + $0x20] sm:$0xff] %vm388_vm1, %v971_v27  ;;  %2020 = vrcp.f32 %v1334_v29  ;;  %v1154_v29 = vld [vmem:[#allocation5 + $0x8] sm:$0xff] }
 0x35f   : > { %v2015_v31 = vpop.eup %2014  ;;  %v950_v34 = vpop.xlane.xlu1 %949 }
 0x360   : > { %v974_v39 = vadd.f32 %v950_v34, %v926_v32  ;;  %1371 = vperm.xlu0 %1949, %v2015_v31  }
 0x361   : > { %v1337_v42 = vld [vmem:[#allocation4 + $0x28] sm:$0xff] }
 0x362   : > { %991 = vst.msk [vmem:[#allocation4 + $0x38] sm:$0xff] %vm388_vm1, %v974_v39  ;;  %2022 = vrcp.f32 %v1337_v42 }
 0x363   : > { %v2017_v41 = vpop.eup %2016  ;;  %v948_v44 = vpop.xlane.xlu0 %947 }
 0x364   : > { %v973_v54 = vadd.f32 %v948_v44, %v925_v46  ;;  %1366 = vperm.xlu1 %1948, %v2017_v41   ;;  %v1155_v44 = vld [vmem:[#allocation5 + $0x10] sm:$0xff] }
 0x365   : > { %v1336_v53 = vld [vmem:[#allocation4 + $0x20] sm:$0xff] }
 0x366   : > { %990 = vst.msk [vmem:[#allocation4 + $0x30] sm:$0xff] %vm388_vm1, %v973_v54  ;;  %2024 = vrcp.f32 %v1336_v53 }
 0x367   : > { %v2019_v61 = vpop.eup %2018  ;;  %v954_v58 = vpop.xlane.xlu1 %953 }
 0x368   : > { %v976_v62 = vadd.f32 %v954_v58, %v928_v57  ;;  %1381 = vperm.xlu0 %1949, %v2019_v61  }
 0x369   : > { %v952_v5 = vpop.xlane.xlu0 %951  ;;  %v1339_v23 = vld [vmem:[#allocation4 + $0x38] sm:$0xff] }
 0x36a   : > { %993 = vst.msk [vmem:[#allocation4 + $0x48] sm:$0xff] %vm388_vm1, %v976_v62  ;;  %v975_v30 = vadd.f32 %v952_v5, %v927_v11  ;;  %2026 = vrcp.f32 %v1339_v23  ;;  %v1157_v11 = vld [vmem:[#allocation5 + $0x20] sm:$0xff] }
 0x36b   : > { %v2021_v19 = vpop.eup %2020 }
 0x36c   : > { %992 = vst.msk [vmem:[#allocation4 + $0x40] sm:$0xff] %vm388_vm1, %v975_v30  ;;  %1376 = vperm.xlu0 %1949, %v2021_v19   ;;  %v1158_v30 = vld [vmem:[#allocation5 + $0x28] sm:$0xff] }
 0x36d   : > { %v1338_v12 = vld [vmem:[#allocation4 + $0x30] sm:$0xff] }
 0x36e   : > { %2028 = vrcp.f32 %v1338_v12 }
 0x36f   : > { %v2023_v4 = vpop.eup %2022  ;;  %v958_v52 = vpop.xlane.xlu1 %957 }
 0x370   : > { %v978_v20 = vadd.f32 %v958_v52, %v930_v3  ;;  %1391 = vperm.xlu0 %1949, %v2023_v4  }
 0x371   : > { %v1341_v14 = vld [vmem:[#allocation4 + $0x48] sm:$0xff] }
 0x372   : > { %995 = vst.msk [vmem:[#allocation4 + $0x58] sm:$0xff] %vm388_vm1, %v978_v20 }
 0x373   : > { %v2025_v51 = vpop.eup %2024  ;;  %v956_v6 = vpop.xlane.xlu0 %955  ;;  %v1340_v37 = vld [vmem:[#allocation4 + $0x40] sm:$0xff] }
 0x374   : > { %v977_v55 = vadd.f32 %v956_v6, %v929_v35  ;;  %1386 = vperm.xlu0 %1949, %v2025_v51   ;;  %2030 = vrcp.f32 %v1340_v37 }
 0x375   : > { %2032 = vrcp.f32 %v1341_v14 }
 0x376   : > { %994 = vst.msk [vmem:[#allocation4 + $0x50] sm:$0xff] %vm388_vm1, %v977_v55  ;;  %v1159_v55 = vld [vmem:[#allocation5 + $0x30] sm:$0xff] }
 0x377   : > { %v2027_v59 = vpop.eup %2026  ;;  %v962_v7 = vpop.xlane.xlu1 %961 }
 0x378   : > { %v980_v60 = vadd.f32 %v962_v7, %v932_v33  ;;  %1401 = vperm.xlu0 %1949, %v2027_v59  }
 0x379   : > { %v1343_v15 = vld [vmem:[#allocation4 + $0x58] sm:$0xff] }
 0x37a   : > { %997 = vst.msk [vmem:[#allocation4 + $0x68] sm:$0xff] %vm388_vm1, %v980_v60  ;;  %2034 = vrcp.f32 %v1343_v15 }
 0x37b   : > { %v2029_v48 = vpop.eup %2028  ;;  %v960_v1 = vpop.xlane.xlu0 %959 }
 0x37c   : > { %v979_v16 = vadd.f32 %v960_v1, %v931_v43  ;;  %1396 = vperm.xlu0 %1949, %v2029_v48   ;;  %v1162_v43 = vld [vmem:[#allocation5 + $0x48] sm:$0xff] }
 0x37d   : > { %v1342_v9 = vld [vmem:[#allocation4 + $0x50] sm:$0xff] }
 0x37e   : > { %2036 = vrcp.f32 %v1342_v9  ;;  %996 = vst.msk [vmem:[#allocation4 + $0x60] sm:$0xff] %vm388_vm1, %v979_v16  ;;  %v1161_v16 = vld [vmem:[#allocation5 + $0x40] sm:$0xff] }
 0x381   : > { %v2031_v38 = vpop.eup %2030  ;;  %v1345_v63 = vld [vmem:[#allocation4 + $0x68] sm:$0xff] }
 0x382   : > { %1406 = vperm.xlu0 %1949, %v2031_v38   ;;  %2038 = vrcp.f32 %v1345_v63  ;;  %v2033_v40 = vpop.eup %2032 }
 0x383   : > { %v964_v10 = vpop.xlane.xlu0 %963  ;;  %v1814_v22 = vpop.f32.mrf.mxu0 }
 0x384   : > { %v981_v25 = vadd.f32 %v964_v10, %v933_v18 }
 0x385   : > { %v1344_v2 = vld [vmem:[#allocation4 + $0x60] sm:$0xff]  ;;  %v1074_v31 = vpop.f32.mrf.mxu0 }
 0x386   : > { %2040 = vrcp.f32 %v1344_v2  ;;  %998 = vst.msk [vmem:[#allocation4 + $0x70] sm:$0xff] %vm388_vm1, %v981_v25  ;;  %1411 = vperm.xlu0 %1949, %v2033_v40   ;;  %v1164_v40 = vld [vmem:[#allocation5 + $0x58] sm:$0xff] }
 0x387   : > { %v966_v24 = vpop.xlane.xlu1 %965  ;;  %v2035_v27 = vpop.eup %2034 }
 0x388   : > { %v982_v26 = vadd.f32 %v966_v24, %v934_v0  ;;  %v1163_v0 = vld [vmem:[#allocation5 + $0x50] sm:$0xff] }
 0x38a   : > { %999 = vst.msk [vmem:[#allocation4 + $0x78] sm:$0xff] %vm388_vm1, %v982_v26  ;;  %1421 = vperm.xlu0 %1949, %v2035_v27  }
 0x38b   : > { %v2037_v32 = vpop.eup %2036  ;;  %v1177_v34 = vpop.permute.xlu1 %1176 }
 0x38c   : > { %v1250_v36 = vmul.f32 %v1177_v34, %v1154_v29  ;;  %v1172_v39 = vpop.permute.xlu0 %1171  ;;  %1416 = vperm.xlu1 %1948, %v2037_v32   ;;  %v1817_v46 = vpop.f32.mrf.mxu0 }
 0x38d   : > { %v1346_v42 = vld [vmem:[#allocation4 + $0x70] sm:$0xff]  ;;  %v1249_v41 = vmul.f32 %v1172_v39, %v1153_v28 }
 0x38e   : > { %2042 = vrcp.f32 %v1346_v42  ;;  %v1266_v56 = vadd.f32 %v1814_v22, %v1250_v36  ;;  %v1084_v58 = vpop.f32.mrf.mxu0  ;;  %v1165_v36 = vld [vmem:[#allocation5 + $0x60] sm:$0xff] }
 0x38f   : > { %v2039_v54 = vpop.eup %2038  ;;  %v1265_v50 = vadd.f32 %v1249_v41, %v1074_v31  ;;  %v1182_v53 = vpop.permute.xlu1 %1181  ;;  %v1166_v31 = vld [vmem:[#allocation5 + $0x68] sm:$0xff] }
 0x390   : > { %1282 = vst.msk [vmem:[#allocation5 + $0x8] sm:$0xff] %vm371_vm0, %v1266_v56  ;;  %v1251_v57 = vmul.f32 %v1182_v53, %v1155_v44  ;;  %v1187_v61 = vpop.permute.xlu0 %1186  ;;  %1431 = vperm.xlu0 %1949, %v2039_v54   ;;  %v1168_v54 = vld [vmem:[#allocation5 + $0x78] sm:$0xff]  ;;  %v1167_v53 = vld [vmem:[#allocation5 + $0x70] sm:$0xff] }
 0x391   : > { %1281 = vst.msk [vmem:[#allocation5] sm:$0xff] %vm371_vm0, %v1265_v50  ;;  %v1252_v62 = vmul.f32 %v1187_v61, %v1156_v49  ;;  %v1347_v5 = vld [vmem:[#allocation4 + $0x78] sm:$0xff] }
 0x392   : > { %v1267_v23 = vadd.f32 %v1251_v57, %v1084_v58  ;;  %2044 = vrcp.f32 %v1347_v5 }
 0x393   : > { %v2041_v19 = vpop.eup %2040  ;;  %v1268_v21 = vadd.f32 %v1817_v46, %v1252_v62  ;;  %v1820_v12 = vpop.f32.mrf.mxu1 }
 0x394   : > { %v1192_v3 = vpop.permute.xlu1 %1191  ;;  %1283 = vst.msk [vmem:[#allocation5 + $0x10] sm:$0xff] %vm371_vm0, %v1267_v23  ;;  %v1197_v52 = vpop.permute.xlu0 %1196  ;;  %1426 = vperm.xlu1 %1948, %v2041_v19  }
 0x395   : > { %v1253_v4 = vmul.f32 %v1192_v3, %v1157_v11  ;;  %1284 = vst.msk [vmem:[#allocation5 + $0x18] sm:$0xff] %vm371_vm0, %v1268_v21  ;;  %v1254_v47 = vmul.f32 %v1197_v52, %v1158_v30  ;;  %v1094_v20 = vpop.f32.mrf.mxu1 }
 0x397   : > { %v1269_v35 = vadd.f32 %v1253_v4, %v1094_v20  ;;  %v1270_v51 = vadd.f32 %v1820_v12, %v1254_v47  ;;  %v1317_v12 = vld [vmem:[#allocation5 + $0x8] sm:$0xff] }
 0x398   : > { %v1202_v6 = vpop.permute.xlu1 %1201  ;;  %v1207_v37 = vpop.permute.xlu0 %1206  ;;  %v1316_v19 = vld [vmem:[#allocation5] sm:$0xff] }
 0x399   : > { %1285 = vst.msk [vmem:[#allocation5 + $0x20] sm:$0xff] %vm371_vm0, %v1269_v35  ;;  %1286 = vst.msk [vmem:[#allocation5 + $0x28] sm:$0xff] %vm371_vm0, %v1270_v51  ;;  %v1256_v14 = vmul.f32 %v1207_v37, %v1160_v13  ;;  %v1255_v8 = vmul.f32 %v1202_v6, %v1159_v55 }
 0x39b   : > { %v2043_v33 = vpop.eup %2042  ;;  %v1823_v59 = vpop.f32.mrf.mxu1  ;;  %v1318_v52 = vld [vmem:[#allocation5 + $0x10] sm:$0xff] }
 0x39c   : > { %v1212_v7 = vpop.permute.xlu1 %1211  ;;  %v1272_v60 = vadd.f32 %v1823_v59, %v1256_v14  ;;  %1436 = vperm.xlu1 %1948, %v2043_v33   ;;  %v1319_v35 = vld [vmem:[#allocation5 + $0x18] sm:$0xff] }
 0x39d   : > { %v1104_v15 = vpop.f32.mrf.mxu1  ;;  %v1257_v63 = vmul.f32 %v1212_v7, %v1161_v16 }
 0x39e   : > { %1288 = vst.msk [vmem:[#allocation5 + $0x38] sm:$0xff] %vm371_vm0, %v1272_v60  ;;  %v1271_v48 = vadd.f32 %v1255_v8, %v1104_v15 }
 0x39f   : > { %v2045_v1 = vpop.eup %2044 }
 0x3a0   : > { %v1217_v9 = vpop.permute.xlu1 %1216  ;;  %1287 = vst.msk [vmem:[#allocation5 + $0x30] sm:$0xff] %vm371_vm0, %v1271_v48  ;;  %1441 = vperm.xlu0 %1949, %v2045_v1   ;;  %v1320_v13 = vld [vmem:[#allocation5 + $0x20] sm:$0xff]  ;;  %v1321_v14 = vld [vmem:[#allocation5 + $0x28] sm:$0xff] }
 0x3a1   : > { %v1258_v45 = vmul.f32 %v1217_v9, %v1162_v43  ;;  %v1826_v38 = vpop.f32.mrf.mxu1 }
 0x3a3   : > { %v1274_v18 = vadd.f32 %v1826_v38, %v1258_v45  ;;  %v1114_v17 = vpop.f32.mrf.mxu1 }
 0x3a4   : > { %v1222_v10 = vpop.permute.xlu1 %1221  ;;  %v1273_v25 = vadd.f32 %v1257_v63, %v1114_v17 }
 0x3a5   : > { %1290 = vst.msk [vmem:[#allocation5 + $0x48] sm:$0xff] %vm371_vm0, %v1274_v18  ;;  %v1259_v27 = vmul.f32 %v1222_v10, %v1163_v0  ;;  %v1323_v15 = vld [vmem:[#allocation5 + $0x38] sm:$0xff] }
 0x3a6   : > { %1289 = vst.msk [vmem:[#allocation5 + $0x40] sm:$0xff] %vm371_vm0, %v1273_v25 }
 0x3a7   : > { %v1322_v7 = vld [vmem:[#allocation5 + $0x30] sm:$0xff] }
 0x3a8   : > { %v1227_v2 = vpop.permute.xlu1 %1226 }
 0x3a9   : > { %v1260_v22 = vmul.f32 %v1227_v2, %v1164_v40 }
 0x3ab   : > { %v1829_v26 = vpop.f32.mrf.mxu1 }
 0x3ac   : > { %v1232_v24 = vpop.permute.xlu1 %1231  ;;  %v1276_v29 = vadd.f32 %v1829_v26, %v1260_v22  ;;  %v1325_v45 = vld [vmem:[#allocation5 + $0x48] sm:$0xff] }
 0x3ad   : > { %v1124_v28 = vpop.f32.mrf.mxu1  ;;  %v1261_v46 = vmul.f32 %v1232_v24, %v1165_v36  ;;  %v1324_v1 = vld [vmem:[#allocation5 + $0x40] sm:$0xff] }
 0x3ae   : > { %1292 = vst.msk [vmem:[#allocation5 + $0x58] sm:$0xff] %vm371_vm0, %v1276_v29  ;;  %v1275_v32 = vadd.f32 %v1259_v27, %v1124_v28 }
 0x3b0   : > { %v1237_v34 = vpop.permute.xlu1 %1236  ;;  %1291 = vst.msk [vmem:[#allocation5 + $0x50] sm:$0xff] %vm371_vm0, %v1275_v32 }
 0x3b1   : > { %v1262_v39 = vmul.f32 %v1237_v34, %v1166_v31 }
 0x3b3   : > { %v1832_v42 = vpop.f32.mrf.mxu1 }
 0x3b4   : > { %v1242_v41 = vpop.permute.xlu1 %1241  ;;  %v1278_v44 = vadd.f32 %v1832_v42, %v1262_v39 }
 0x3b5   : > { %v1134_v56 = vpop.f32.mrf.mxu1  ;;  %v1263_v58 = vmul.f32 %v1242_v41, %v1167_v53  ;;  %v1327_v25 = vld [vmem:[#allocation5 + $0x58] sm:$0xff] }
 0x3b6   : > { %1294 = vst.msk [vmem:[#allocation5 + $0x68] sm:$0xff] %vm371_vm0, %v1278_v44  ;;  %v1277_v49 = vadd.f32 %v1261_v46, %v1134_v56 }
 0x3b7   : > { %v1326_v63 = vld [vmem:[#allocation5 + $0x50] sm:$0xff] }
 0x3b8   : > { %1293 = vst.msk [vmem:[#allocation5 + $0x60] sm:$0xff] %vm371_vm0, %v1277_v49  ;;  %v1247_v50 = vpop.permute.xlu1 %1246 }
 0x3b9   : > { %v1264_v57 = vmul.f32 %v1247_v50, %v1168_v54 }
 0x3bd   : > { %v1329_v26 = vld [vmem:[#allocation5 + $0x68] sm:$0xff] }
 0x3be   : > { %v1835_v61 = vpop.f32.mrf.mxu1 }
 0x3bf   : > { %v1280_v62 = vadd.f32 %v1835_v61, %v1264_v57  ;;  %v1328_v2 = vld [vmem:[#allocation5 + $0x60] sm:$0xff] }
 0x3c0   : > { %v1144_v11 = vpop.f32.mrf.mxu1 }
 0x3c1   : > { %1296 = vst.msk [vmem:[#allocation5 + $0x78] sm:$0xff] %vm371_vm0, %v1280_v62  ;;  %v1279_v5 = vadd.f32 %v1263_v58, %v1144_v11 }
 0x3c3   : > { %1295 = vst.msk [vmem:[#allocation5 + $0x70] sm:$0xff] %vm371_vm0, %v1279_v5 }
 0x3c8   : > { %v1331_v31 = vld [vmem:[#allocation5 + $0x78] sm:$0xff] }
 0x3ca   : > { %v1330_v29 = vld [vmem:[#allocation5 + $0x70] sm:$0xff] }
 0x3db   : > { %v1372_v23 = vpop.permute.xlu0 %1371 }
 0x3dc   : > { %v1445_v4 = vmul.f32 %v1372_v23, %v1317_v12 }
 0x3df   : > { %v1367_v30 = vpop.permute.xlu1 %1366 }
 0x3e0   : > { %v1444_v21 = vmul.f32 %v1367_v30, %v1316_v19 }
 0x3e2   : > { %1460 = vxpose.xlu1.b32.start [1/16] (narrow) %v1444_v21, 64 }
 0x3e3   : > { %v1382_v3 = vpop.permute.xlu0 %1381 }
 0x3e4   : > { %v1447_v6 = vmul.f32 %v1382_v3, %v1319_v35 }
 0x3e6   : > { %1461 = vxpose.xlu1.b32.cont [2/16] (narrow) %v1445_v4, 64 }
 0x3e7   : > { %v1377_v47 = vpop.permute.xlu0 %1376 }
 0x3e8   : > { %v1446_v20 = vmul.f32 %v1377_v47, %v1318_v52 }
 0x3ea   : > { %1462 = vxpose.xlu1.b32.cont [3/16] (narrow) %v1446_v20, 64 }
 0x3eb   : > { %v1392_v51 = vpop.permute.xlu0 %1391 }
 0x3ec   : > { %v1449_v59 = vmul.f32 %v1392_v51, %v1321_v14 }
 0x3ee   : > { %1463 = vxpose.xlu1.b32.cont [4/16] (narrow) %v1447_v6, 64 }
 0x3ef   : > { %v1387_v37 = vpop.permute.xlu0 %1386 }
 0x3f0   : > { %v1448_v55 = vmul.f32 %v1387_v37, %v1320_v13 }
 0x3f2   : > { %1464 = vxpose.xlu1.b32.cont [5/16] (narrow) %v1448_v55, 64 }
 0x3f3   : > { %v1402_v33 = vpop.permute.xlu0 %1401 }
 0x3f4   : > { %v1451_v43 = vmul.f32 %v1402_v33, %v1323_v15 }
 0x3f6   : > { %1465 = vxpose.xlu1.b32.cont [6/16] (narrow) %v1449_v59, 64 }
 0x3f7   : > { %v1397_v8 = vpop.permute.xlu0 %1396 }
 0x3f8   : > { %v1450_v60 = vmul.f32 %v1397_v8, %v1322_v7 }
 0x3fa   : > { %1466 = vxpose.xlu1.b32.cont [7/16] (narrow) %v1450_v60, 64 }
 0x3fd   : > { %v1407_v48 = vpop.permute.xlu0 %1406 }
 0x3fe   : > { %1467 = vxpose.xlu1.b32.cont [8/16] (narrow) %v1451_v43, 64  ;;  %v1452_v16 = vmul.f32 %v1407_v48, %v1324_v1 }
 0x401   : > { %v1412_v9 = vpop.permute.xlu0 %1411 }
 0x402   : > { %1468 = vxpose.xlu1.b32.cont [9/16] (narrow) %v1452_v16, 64  ;;  %v1453_v38 = vmul.f32 %v1412_v9, %v1325_v45 }
 0x405   : > { %v1422_v17 = vpop.permute.xlu0 %1421 }
 0x406   : > { %1469 = vxpose.xlu1.b32.cont [10/16] (narrow) %v1453_v38, 64  ;;  %v1455_v40 = vmul.f32 %v1422_v17, %v1327_v25 }
 0x407   : > { %v1417_v18 = vpop.permute.xlu1 %1416 }
 0x408   : > { %v1454_v10 = vmul.f32 %v1417_v18, %v1326_v63 }
 0x40a   : > { %1470 = vxpose.xlu1.b32.cont [11/16] (narrow) %v1454_v10, 64 }
 0x40b   : > { %v1432_v24 = vpop.permute.xlu0 %1431 }
 0x40c   : > { %v1457_v27 = vmul.f32 %v1432_v24, %v1329_v26 }
 0x40e   : > { %1471 = vxpose.xlu1.b32.cont [12/16] (narrow) %v1455_v40, 64 }
 0x40f   : > { %v1427_v0 = vpop.permute.xlu1 %1426 }
 0x410   : > { %v1456_v22 = vmul.f32 %v1427_v0, %v1328_v2 }
 0x412   : > { %1472 = vxpose.xlu1.b32.cont [13/16] (narrow) %v1456_v22, 64 }
 0x416   : > { %1473 = vxpose.xlu1.b32.cont [14/16] (narrow) %v1457_v27, 64 }
 0x417   : > { %v1437_v28 = vpop.permute.xlu1 %1436 }
 0x418   : > { %v1458_v32 = vmul.f32 %v1437_v28, %v1330_v29 }
 0x41a   : > { %1474 = vxpose.xlu1.b32.cont [15/16] (narrow) %v1458_v32, 64 }
 0x41b   : > { %v1442_v34 = vpop.permute.xlu0 %1441 }
 0x41c   : > { %v1459_v36 = vmul.f32 %v1442_v34, %v1331_v31 }
 0x41e   : > { %1475 = vxpose.xlu1.b32.end [16/16] (narrow) %v1459_v36, 64 }
 0x45e   : > { %v1476_v39 = vpop.trf.xlu1 }
 0x45f   : > { %1492 = vst [vmem:[%s318_s27] sm:$0xff] %v1476_v39 }
 0x462   : > { %v1477_v42 = vpop.trf.xlu1 }
 0x463   : > { %1493 = vst [vmem:[%s318_s27 + $0x8] sm:$0xff] %v1477_v42 }
 0x466   : > { %v1478_v46 = vpop.trf.xlu1 }
 0x467   : > { %1494 = vst [vmem:[%s318_s27 + $0x10] sm:$0xff] %v1478_v46 }
 0x46a   : > { %v1479_v41 = vpop.trf.xlu1 }
 0x46b   : > { %1495 = vst [vmem:[%s318_s27 + $0x18] sm:$0xff] %v1479_v41 }
 0x46e   : > { %v1480_v44 = vpop.trf.xlu1 }
 0x46f   : > { %1496 = vst [vmem:[%s318_s27 + $0x20] sm:$0xff] %v1480_v44 }
 0x472   : > { %v1481_v56 = vpop.trf.xlu1 }
 0x473   : > { %1497 = vst [vmem:[%s318_s27 + $0x28] sm:$0xff] %v1481_v56 }
 0x476   : > { %v1482_v49 = vpop.trf.xlu1 }
 0x477   : > { %1498 = vst [vmem:[%s318_s27 + $0x30] sm:$0xff] %v1482_v49 }
 0x47a   : > { %v1483_v54 = vpop.trf.xlu1 }
 0x47b   : > { %1499 = vst [vmem:[%s318_s27 + $0x38] sm:$0xff] %v1483_v54 }
 0x47c   : > { %2145 = shalt.err (!%p2142_p3)
}
 0x47d   : > { %s2146_s22 = scalar_lea.hbm %s2904_s29, 1024  ;;  %s2150_s30 = scalar_lea.hbm %s2960_s3, 4096 }
 0x47e   : > { %p2147_p4 = scmp.ne.s32.totalorder %s2904_s29, %s2146_s22  ;;  %p2151_p7 = scmp.lt.s32.totalorder %s2904_s29, %s2960_s3 }
 0x47f   : > { %p2152_p10 = scmp.lt.s32.totalorder %s2150_s30, %s2146_s22 }
 0x480   : > { %p2148_p5 = pnand %p2147_p4, %p2334_p9 }
 0x481   : > { %p2153_p8 = por %p2152_p10, %p2151_p7 }
 0x482   : > { %p2149_p6 = pneg %p2148_p5 }
 0x484   : > { %p2154_p0 = pnand %p2153_p8, %p2149_p6 }
 0x486   : > { %2157 = shalt.err (!%p2154_p0)
}
 0x487   : > { %s2243_s25 = smov 128   ;;  %s2244_s20 = smov 8  }
 0x488   : > { %1859 = dma.vmem_to_hbm [thread:$0]  (%p2334_p9), %s2899_s24, 1024, %s2904_s29, %s1501_s15, %s2243_s25, %s2243_s25, %s2244_s20  }
 0x489 PF: > { %p1876_p1 = scmp.ge.s32.totalorder %s2232_s19, 2  ;;  %s1532_s18 = sand.u32 1, %s2204_s12  }
 0x48a   : > { %s1533_s9 = scalar_lea.sflag [#allocation8], %s1532_s18 }
 0x48b   : > { %p1872_p2 = pnand %p1876_p1, %p2340_p12 }
 0x48d   : > { %p1873_p11 = pneg %p1872_p2 }
 0x48f   : > { %2199 = dma.done.wait (%p1873_p11), %s1533_s9, 1024  }
 0x490   : > { %2201 = vsyncadd (%p1873_p11), %s1533_s9, 4294966272  ;;  %s22_s19 = sadd.s32 1, %s2232_s19   ;;  %s2999_s28 = sld [smem:[#allocation21_spill]] }
 0x491   : > { %p19_p13 = scmp.ge.s32.totalorder %s22_s19, 6   ;;  %s3000_s15 = sld [smem:[#allocation16_spill]] }
 0x492   : > { %s3001_s16 = sld [smem:[#allocation17_spill]]  ;;  %s3004_s12 = smov %s2208_s13 }
 0x493   : > { %s3002_s17 = sld [smem:[#allocation18_spill]]  ;;  %s3005_s13 = smov %s2212_s14 }
 0x494   : > { %s3003_s18 = sld [smem:[#allocation19_spill]]  ;;  %21 = sbr.rel (!%p19_p13) target bundleno = 11 (0xb), region = 109 }
 0x496   : > { %s3006_s14 = smov %s2999_s28 }
 0x499   :  { %1538 = vsyncpa [#allocation7], 1 }
 0x49a   :  { %1540 = vsyncpa [#allocation7 + $0x1], 1 }
 0x49b   :  { %1541 = vsyncpa [#allocation10], 1 }
 0x49c   :  { %1543 = vsyncpa [#allocation10 + $0x1], 1 }
 0x49d   :  { %1544 = vsyncpa [#allocation8], 1 }
 0x49e   :  { %1546 = vsyncpa [#allocation8 + $0x1], 1 }

</bundles_post_ra>
